<compile_context>
chip_gen: v7x
topology: tpu7x:2x2x1
jax: 0.10.0
libtpu: 0.0.40
codegen_flags: <defaults>
</compile_context>

<pallas_src>
import jax
import jax.numpy as jnp
from jax.experimental import pallas as pl
from jax.experimental.pallas import tpu as pltpu

EPS = 1e-5
LANE = 128
BIG = 3.0e38
INT_MAX = 0x7FFFFFFF
INF_BITS = 0x7F800000          # f32 +inf bit pattern; larger than any finite distance
VMEM_LIMIT = 32 * 1024 * 1024


def _ru(x, m):
    return (x + m - 1) // m * m


# --------------------------------------------------------------------------- #
# Kernel 1: fused pairwise distance + segment masking + running top-k (kNN).  #
# Grid: (query row tiles [parallel], key column tiles [arbitrary]).           #
# Packed int32 keys: one min gives (dist, column); one max gives worst slot.  #
# --------------------------------------------------------------------------- #
def _knn_kernel(n_o_ref, o_ref, q_ref, kT_ref, idx_ref, bd_ref, bi_ref):
    i = pl.program_id(0)
    j = pl.program_id(1)
    TQ = q_ref.shape[0]
    TK = kT_ref.shape[1]
    K = idx_ref.shape[1]
    B = o_ref.shape[0]
    LMASK = TK - 1                                # TK is a power of two
    SMASK = (1 << max(1, (K - 1).bit_length())) - 1

    slot_iota = jax.lax.broadcasted_iota(jnp.int32, (TQ, K), 1)

    @pl.when(j == 0)
    def _():
        # init: +inf distance bits with the slot id packed in the low bits.
        bd_ref[...] = jnp.int32(INF_BITS) | slot_iota
        bi_ref[...] = jnp.zeros((TQ, K), jnp.int32)

    # Exact squared distance on the VPU (no a^2+b^2-2ab cancellation).
    q = q_ref[...]                                     # (TQ, 3)
    kT = kT_ref[...]                                   # (3, TK)
    d = jnp.zeros((TQ, TK), jnp.float32)
    for c in range(3):
        diff = q[:, c:c + 1] - kT[c:c + 1, :]
        d = d + diff * diff

    # Same-segment mask from cumulative offsets held in SMEM (scalar prefetch).
    qg = i * TQ + jax.lax.broadcasted_iota(jnp.int32, (TQ, 1), 0)
    kg = j * TK + jax.lax.broadcasted_iota(jnp.int32, (1, TK), 1)
    qb = jnp.zeros((TQ, 1), jnp.int32)
    kb = jnp.zeros((1, TK), jnp.int32)
    for b in range(B):
        qb = qb + (qg >= n_o_ref[b]).astype(jnp.int32)
        kb = kb + (kg >= o_ref[b]).astype(jnp.int32)

    # Sortable key: distance bits (f32 >= 0 is monotone under int reinterpretation)
    # with the low log2(TK) bits replaced by the tile-local column.
    col_row = jax.lax.broadcasted_iota(jnp.int32, (1, TK), 1)
    keys = (pltpu.bitcast(d, jnp.int32) & jnp.int32(~LMASK)) | col_row
    keys = jnp.where(qb == kb, keys, jnp.int32(INT_MAX))
    # NOTE: segments with < nsample points keep index-0 filler slots here;
    # pointops.knnquery pads with in-segment repeats instead.

    # Merge this key tile into the running per-row top-K kept in VMEM scratch.
    bd = bd_ref[...]
    bi = bi_ref[...]
    for _ in range(K):
        mk = jnp.min(keys, axis=1, keepdims=True)           # packed (dist, col) min
        sel_col = mk & jnp.int32(LMASK)
        vd = mk & jnp.int32(~LMASK)                          # truncated distance bits
        gidx = sel_col + j * TK                              # global key index (int32)
        keys = jnp.where(col_row == sel_col, jnp.int32(INT_MAX), keys)   # consume
        wk = jnp.max(bd, axis=1, keepdims=True)              # packed (worst, slot)
        wslot = wk & jnp.int32(SMASK)
        repl = (slot_iota == wslot) & (vd < wk)              # evict worst slot if better
        bd = jnp.where(repl, vd | slot_iota, bd)
        bi = jnp.where(repl, gidx, bi)
    bd_ref[...] = bd
    bi_ref[...] = bi

    @pl.when(j == pl.num_programs(1) - 1)
    def _():
        idx_ref[...] = bi


def knn_pallas(queries, keys, n_o, o, nsample):
    M = queries.shape[0]
    N = keys.shape[0]
    TQ = min(128, _ru(M, 8))
    TK = LANE
    while TK < 512 and TK < N:                       # power-of-two key tile, <= 512
        TK *= 2
    M_pad = _ru(M, TQ)
    N_pad = _ru(N, TK)
    qp = jnp.zeros((M_pad, 3), jnp.float32).at[:M].set(queries)
    kTp = jnp.zeros((3, N_pad), jnp.float32).at[:, :N].set(keys.T)

    idx = pl.pallas_call(
        _knn_kernel,
        grid_spec=pltpu.PrefetchScalarGridSpec(
            num_scalar_prefetch=2,
            grid=(M_pad // TQ, N_pad // TK),
            in_specs=[pl.BlockSpec((TQ, 3), lambda i, j, *_: (i, 0)),
                      pl.BlockSpec((3, TK), lambda i, j, *_: (0, j))],
            out_specs=pl.BlockSpec((TQ, nsample), lambda i, j, *_: (i, 0)),
            scratch_shapes=[pltpu.VMEM((TQ, nsample), jnp.int32),
                            pltpu.VMEM((TQ, nsample), jnp.int32)]),
        out_shape=jax.ShapeDtypeStruct((M_pad, nsample), jnp.int32),
        compiler_params=pltpu.CompilerParams(
            dimension_semantics=("parallel", "arbitrary"),
            vmem_limit_bytes=VMEM_LIMIT),
    )(n_o, o, qp, kTp)
    return idx[:M]


# --------------------------------------------------------------------------- #
# Kernel 2: per-channel sum / sum-of-squares of linear(grouped) (BN stats).   #
# Grid: (row tiles [parallel], neighbor k [arbitrary]); partial stats per row #
# tile (megacore friendly), summed in XLA.                                    #
# --------------------------------------------------------------------------- #
def _stats_kernel(g_ref, w_ref, st_ref):
    k = pl.program_id(1)

    @pl.when(k == 0)
    def _():
        st_ref[...] = jnp.zeros(st_ref.shape, jnp.float32)

    h = jnp.dot(g_ref[...], w_ref[...], preferred_element_type=jnp.float32)
    # Padded rows of g are zero, so they contribute nothing -- no mask needed.
    st_ref[0:1, :] += jnp.sum(h, axis=0, keepdims=True)
    st_ref[1:2, :] += jnp.sum(h * h, axis=0, keepdims=True)


# --------------------------------------------------------------------------- #
# Kernel 3: linear -> scale/shift (precomputed BN) -> ReLU -> running max     #
# over the neighbor axis.  Grid: (row tiles [parallel], neighbor k            #
# [arbitrary]); the lane-dense output block is resident across k and doubles  #
# as the max accumulator.                                                     #
# --------------------------------------------------------------------------- #
def _norm_max_kernel(g_ref, w_ref, ss_ref, o_ref):
    k = pl.program_id(1)
    h = jnp.dot(g_ref[...], w_ref[...], preferred_element_type=jnp.float32)
    y = jnp.maximum(h * ss_ref[0:1, :] + ss_ref[1:2, :], 0.0)

    @pl.when(k == 0)
    def _():
        o_ref[...] = y

    @pl.when(k > 0)
    def _():
        o_ref[...] = jnp.maximum(o_ref[...], y)


def grouped_linear_bn_relu_max(g, w, gamma, beta):
    """max_k relu(BN(linear(g[:, k, :]))) for g of shape (R, K, Cin)."""
    R, K, Cin = g.shape
    Cout = w.shape[0]
    Cout_p = _ru(Cout, LANE)
    TR = min(1024, _ru(R, 8))
    R_pad = _ru(R, TR)
    n_tiles = R_pad // TR

    # (K, R_pad, Cin) bf16, Cin deliberately NOT lane-padded (block dim == full dim).
    # TODO(synk): the transpose/cast/pad glue could be fused into the gather producer.
    gp = jnp.zeros((K, R_pad, Cin), jnp.bfloat16)
    gp = gp.at[:, :R, :].set(jnp.transpose(g, (1, 0, 2)).astype(jnp.bfloat16))
    wp = jnp.zeros((Cin, Cout_p), jnp.bfloat16).at[:, :Cout].set(
        w.T.astype(jnp.bfloat16))

    grid = (n_tiles, K)
    g_spec = pl.BlockSpec((None, TR, Cin), lambda i, k: (k, i, 0))
    w_spec = pl.BlockSpec((Cin, Cout_p), lambda i, k: (0, 0))

    stats = pl.pallas_call(
        _stats_kernel,
        grid_spec=pltpu.PrefetchScalarGridSpec(
            num_scalar_prefetch=0, grid=grid,
            in_specs=[g_spec, w_spec],
            out_specs=pl.BlockSpec((None, 2, Cout_p), lambda i, k: (i, 0, 0))),
        out_shape=jax.ShapeDtypeStruct((n_tiles, 2, Cout_p), jnp.float32),
        compiler_params=pltpu.CompilerParams(
            dimension_semantics=("parallel", "arbitrary"),
            vmem_limit_bytes=VMEM_LIMIT),
    )(gp, wp)

    # BN scale/shift computed once in XLA from the partial sums (tiny vectors).
    tot = jnp.sum(stats, axis=0)                         # (2, Cout_p)
    inv = 1.0 / float(R * K)
    mean = tot[0] * inv
    var = jnp.maximum(tot[1] * inv - mean * mean, 0.0)
    gamma_p = jnp.zeros((Cout_p,), jnp.float32).at[:Cout].set(gamma)
    beta_p = jnp.zeros((Cout_p,), jnp.float32).at[:Cout].set(beta)
    scale = gamma_p * jax.lax.rsqrt(var + EPS)
    shift = beta_p - mean * scale
    ss = jnp.stack([scale, shift], axis=0)               # (2, Cout_p)

    y = pl.pallas_call(
        _norm_max_kernel,
        grid_spec=pltpu.PrefetchScalarGridSpec(
            num_scalar_prefetch=0, grid=grid,
            in_specs=[g_spec, w_spec,
                      pl.BlockSpec((2, Cout_p), lambda i, k: (0, 0))],
            out_specs=pl.BlockSpec((TR, Cout_p), lambda i, k: (i, 0))),
        out_shape=jax.ShapeDtypeStruct((R_pad, Cout_p), jnp.float32),
        compiler_params=pltpu.CompilerParams(
            dimension_semantics=("parallel", "arbitrary"),
            vmem_limit_bytes=VMEM_LIMIT),
    )(gp, wp, ss)

    return y[:R, :Cout]


# ------------------------------- JAX glue ---------------------------------- #
def _fps_segment(p_seg, m):
    """pointops.furthestsampling within one segment (seeds with first point)."""
    n = p_seg.shape[0]

    def body(t, carry):
        sel, dist, last = carry
        delta = p_seg - p_seg[last]
        dist = jnp.minimum(dist, jnp.sum(delta * delta, axis=1))
        nxt = jnp.argmax(dist).astype(jnp.int32)
        return sel.at[t].set(nxt), dist, nxt

    init = (jnp.zeros((m,), jnp.int32),
            jnp.full((n,), 1e10, jnp.float32),
            jnp.int32(0))
    sel, _, _ = jax.lax.fori_loop(1, m, body, init)
    return sel


def transition_down_forward(pxo, params, *, stride=1, nsample=16):
    p, x, o = pxo
    w, gamma, beta = params["w"], params["gamma"], params["beta"]

    if stride != 1:
        # downsampled offsets (host scalars, mirrors the reference .item() loop)
        o_host = [int(v) for v in o]
        n_o_host, cnt, prev = [], 0, 0
        for e in o_host:
            cnt += (e - prev) // stride
            n_o_host.append(cnt)
            prev = e
        n_o = jnp.asarray(n_o_host, jnp.int32)

        # TODO(synk): furthest point sampling stays in plain JAX (sequential, data-dependent argmax).
        idx_parts, prev, prev_m = [], 0, 0
        for b, e in enumerate(o_host):
            m_b = n_o_host[b] - prev_m
            idx_parts.append(prev + _fps_segment(p[prev:e], m_b))
            prev, prev_m = e, n_o_host[b]
        idx = jnp.concatenate(idx_parts)
        n_p = p[idx]                                       # (M, 3)

        knn = knn_pallas(n_p, p, n_o, o.astype(jnp.int32), nsample)   # (M, K) int32

        # TODO(synk): neighbor gather + (K, M, C) packing stays as an XLA gather; could be fused via scalar-prefetched indices + per-row DMA.
        rel = p[knn] - n_p[:, None, :]                     # (M, K, 3)
        feats = x[knn]                                     # (M, K, Cin)
        g = jnp.concatenate([rel, feats], axis=-1)         # (M, K, 3 + Cin)

        y = grouped_linear_bn_relu_max(g, w, gamma, beta)  # (M, Cout)
        return [n_p, y, n_o]

    # stride == 1: relu(bn(linear(x))) -- same kernels with a single "neighbor".
    y = grouped_linear_bn_relu_max(x[:, None, :], w, gamma, beta)
    return [p, y, o]


# ------------------------ pure-JAX reference (f32) -------------------------- #
def _ref_transition_down(p, x, o, params, stride, nsample):
    w, gamma, beta = params["w"], params["gamma"], params["beta"]
    if stride == 1:
        h = x @ w.T
        mean = h.mean(0)
        var = ((h - mean) ** 2).mean(0)
        return jnp.maximum((h - mean) * jax.lax.rsqrt(var + EPS) * gamma + beta, 0.0)

    o_host = [int(v) for v in o]
    n_o_host, cnt, prev = [], 0, 0
    for e in o_host:
        cnt += (e - prev) // stride
        n_o_host.append(cnt)
        prev = e
    idx_parts, prev, prev_m = [], 0, 0
    for b, e in enumerate(o_host):
        m_b = n_o_host[b] - prev_m
        idx_parts.append(prev + _fps_segment(p[prev:e], m_b))
        prev, prev_m = e, n_o_host[b]
    idx = jnp.concatenate(idx_parts)
    n_p = p[idx]
    bid_q = jnp.sum(jnp.arange(n_p.shape[0])[:, None] >= jnp.asarray(n_o_host)[None, :], 1)
    bid_k = jnp.sum(jnp.arange(p.shape[0])[:, None] >= jnp.asarray(o_host)[None, :], 1)
    d = jnp.sum((n_p[:, None, :] - p[None, :, :]) ** 2, -1)
    d = jnp.where(bid_q[:, None] == bid_k[None, :], d, BIG)
    knn = jax.lax.top_k(-d, nsample)[1]
    g = jnp.concatenate([p[knn] - n_p[:, None, :], x[knn]], -1)
    h = g @ w.T
    hm = h.reshape(-1, h.shape[-1])
    mean = hm.mean(0)
    var = ((hm - mean) ** 2).mean(0)
    y = jnp.maximum((h - mean) * jax.lax.rsqrt(var + EPS) * gamma + beta, 0.0)
    return jnp.max(y, axis=1)


if __name__ == "__main__":
    key = jax.random.PRNGKey(0)
    kp, kx, kw1, kw2, kg, kb = jax.random.split(key, 6)

    N, in_planes, out_planes, stride, nsample = 64, 32, 64, 4, 16
    p = jax.random.normal(kp, (N, 3), jnp.float32)
    x = jax.random.normal(kx, (N, in_planes), jnp.float32)
    o = jnp.array([32, 64], jnp.int32)                     # two clouds of 32 points

    gamma = 1.0 + 0.05 * jax.random.normal(kg, (out_planes,), jnp.float32)
    beta = 0.05 * jax.random.normal(kb, (out_planes,), jnp.float32)

    # stride != 1 branch (FPS + kNN grouping + linear/BN/ReLU/maxpool)
    params_s = {"w": 0.1 * jax.random.normal(kw1, (out_planes, 3 + in_planes), jnp.float32),
                "gamma": gamma, "beta": beta}
    n_p, y, n_o = transition_down_forward([p, x, o], params_s,
                                          stride=stride, nsample=nsample)
    jax.block_until_ready(y)
    M = int(n_o[-1])
    assert n_p.shape == (M, 3)
    assert y.shape == (M, out_planes) and y.dtype == jnp.float32
    y_ref = _ref_transition_down(p, x, o, params_s, stride, nsample)
    assert bool(jnp.max(jnp.abs(y - y_ref)) < 0.25)        # bf16-matmul tolerance

    # stride == 1 branch (plain linear/BN/ReLU)
    params_1 = {"w": 0.1 * jax.random.normal(kw2, (out_planes, in_planes), jnp.float32),
                "gamma": gamma, "beta": beta}
    p1, y1, o1 = transition_down_forward([p, x, o], params_1, stride=1, nsample=nsample)
    jax.block_until_ready(y1)
    assert y1.shape == (N, out_planes) and y1.dtype == jnp.float32
    y1_ref = _ref_transition_down(p, x, o, params_1, 1, nsample)
    assert bool(jnp.max(jnp.abs(y1 - y1_ref)) < 0.25)

    print("KERNEL_OK")
</pallas_src>

<mosaic_0001>
module attributes {stable_mosaic.version = 11 : i64} {
  func.func @_knn_kernel(%arg0: i32, %arg1: i32, %arg2: memref<2xi32, #tpu.memory_space<smem>>, %arg3: memref<2xi32, #tpu.memory_space<smem>>, %arg4: memref<16x3xf32, #tpu.memory_space<vmem>>, %arg5: memref<3x128xf32, #tpu.memory_space<vmem>>, %arg6: memref<16x16xi32, #tpu.memory_space<vmem>>, %arg7: memref<16x16xi32, #tpu.memory_space<vmem>>, %arg8: memref<16x16xi32, #tpu.memory_space<vmem>>) attributes {dimension_semantics = [#tpu.dimension_semantics<parallel>, #tpu.dimension_semantics<arbitrary>], iteration_bounds = array<i64: 1, 1>, scalar_prefetch = 2 : i64, scratch_operands = 2 : i64, tpu.core_type = #tpu.core_type<tc>, window_params = [{transform_indices = @transform_0, window_bounds = array<i64: 16, 3>}, {transform_indices = @transform_1, window_bounds = array<i64: 3, 128>}, {transform_indices = @transform_2, window_bounds = array<i64: 16, 16>}]} {
    %0 = tpu.iota {dimensions = array<i32: 1>} : vector<16x16xi32>
    %c0_i32 = arith.constant 0 : i32
    %1 = arith.cmpi eq, %arg1, %c0_i32 : i32
    %2 = arith.extui %1 : i1 to i32
    %c0_i32_0 = arith.constant 0 : i32
    %3 = arith.cmpi ne, %2, %c0_i32_0 : i32
    scf.if %3 {
      %c2139095040_i32 = arith.constant 2139095040 : i32
      %535 = vector.broadcast %c2139095040_i32 : i32 to vector<16x16xi32>
      %536 = arith.ori %535, %0 : vector<16x16xi32>
      %c0_128 = arith.constant 0 : index
      %c0_129 = arith.constant 0 : index
      %537 = vector.load %arg7[%c0_128, %c0_129] : memref<16x16xi32, #tpu.memory_space<vmem>>, vector<16x16xi32>
      tpu.vector_store %arg7[%c0_128, %c0_129], %536 {strides = array<i32>} : memref<16x16xi32, #tpu.memory_space<vmem>>, vector<16x16xi32>,
      %c0_i32_130 = arith.constant 0 : i32
      %538 = vector.broadcast %c0_i32_130 : i32 to vector<16x16xi32>
      %c0_131 = arith.constant 0 : index
      %c0_132 = arith.constant 0 : index
      %539 = vector.load %arg8[%c0_131, %c0_132] : memref<16x16xi32, #tpu.memory_space<vmem>>, vector<16x16xi32>
      tpu.vector_store %arg8[%c0_131, %c0_132], %538 {strides = array<i32>} : memref<16x16xi32, #tpu.memory_space<vmem>>, vector<16x16xi32>,
    } else {
    }
    %c0 = arith.constant 0 : index
    %c0_1 = arith.constant 0 : index
    %4 = vector.load %arg4[%c0, %c0_1] : memref<16x3xf32, #tpu.memory_space<vmem>>, vector<16x3xf32>
    %c0_2 = arith.constant 0 : index
    %c0_3 = arith.constant 0 : index
    %5 = vector.load %arg5[%c0_2, %c0_3] : memref<3x128xf32, #tpu.memory_space<vmem>>, vector<3x128xf32>
    %cst = arith.constant 0.000000e+00 : f32
    %6 = vector.broadcast %cst : f32 to vector<16x128xf32>
    %7 = vector.extract_strided_slice %4 {offsets = [0, 0], sizes = [16, 1], strides = [1, 1]} : vector<16x3xf32> to vector<16x1xf32>
    %8 = vector.extract_strided_slice %5 {offsets = [0, 0], sizes = [1, 128], strides = [1, 1]} : vector<3x128xf32> to vector<1x128xf32>
    %9 = vector.broadcast %7 : vector<16x1xf32> to vector<16x128xf32>
    %10 = vector.broadcast %8 : vector<1x128xf32> to vector<16x128xf32>
    %11 = arith.subf %9, %10 : vector<16x128xf32>
    %12 = arith.mulf %11, %11 : vector<16x128xf32>
    %13 = arith.addf %6, %12 : vector<16x128xf32>
    %14 = vector.extract_strided_slice %4 {offsets = [0, 1], sizes = [16, 1], strides = [1, 1]} : vector<16x3xf32> to vector<16x1xf32>
    %15 = vector.extract_strided_slice %5 {offsets = [1, 0], sizes = [1, 128], strides = [1, 1]} : vector<3x128xf32> to vector<1x128xf32>
    %16 = vector.broadcast %14 : vector<16x1xf32> to vector<16x128xf32>
    %17 = vector.broadcast %15 : vector<1x128xf32> to vector<16x128xf32>
    %18 = arith.subf %16, %17 : vector<16x128xf32>
    %19 = arith.mulf %18, %18 : vector<16x128xf32>
    %20 = arith.addf %13, %19 : vector<16x128xf32>
    %21 = vector.extract_strided_slice %4 {offsets = [0, 2], sizes = [16, 1], strides = [1, 1]} : vector<16x3xf32> to vector<16x1xf32>
    %22 = vector.extract_strided_slice %5 {offsets = [2, 0], sizes = [1, 128], strides = [1, 1]} : vector<3x128xf32> to vector<1x128xf32>
    %23 = vector.broadcast %21 : vector<16x1xf32> to vector<16x128xf32>
    %24 = vector.broadcast %22 : vector<1x128xf32> to vector<16x128xf32>
    %25 = arith.subf %23, %24 : vector<16x128xf32>
    %26 = arith.mulf %25, %25 : vector<16x128xf32>
    %27 = arith.addf %20, %26 : vector<16x128xf32>
    %c16_i32 = arith.constant 16 : i32
    %28 = arith.muli %arg0, %c16_i32 : i32
    %29 = tpu.iota {dimensions = array<i32: 0>} : vector<16x1xi32>
    %30 = vector.broadcast %28 : i32 to vector<16x1xi32>
    %31 = arith.addi %30, %29 : vector<16x1xi32>
    %c128_i32 = arith.constant 128 : i32
    %32 = arith.muli %arg1, %c128_i32 : i32
    %33 = tpu.iota {dimensions = array<i32: 1>} : vector<1x128xi32>
    %34 = vector.broadcast %32 : i32 to vector<1x128xi32>
    %35 = arith.addi %34, %33 : vector<1x128xi32>
    %c0_i32_4 = arith.constant 0 : i32
    %36 = vector.broadcast %c0_i32_4 : i32 to vector<16x1xi32>
    %c0_i32_5 = arith.constant 0 : i32
    %37 = vector.broadcast %c0_i32_5 : i32 to vector<1x128xi32>
    %c0_6 = arith.constant 0 : index
    %38 = memref.load %arg2[%c0_6] : memref<2xi32, #tpu.memory_space<smem>>
    %39 = vector.broadcast %38 : i32 to vector<16x1xi32>
    %40 = arith.cmpi sge, %31, %39 : vector<16x1xi32>
    %41 = arith.extui %40 : vector<16x1xi1> to vector<16x1xi32>
    %42 = arith.addi %36, %41 : vector<16x1xi32>
    %c0_7 = arith.constant 0 : index
    %43 = memref.load %arg3[%c0_7] : memref<2xi32, #tpu.memory_space<smem>>
    %44 = vector.broadcast %43 : i32 to vector<1x128xi32>
    %45 = arith.cmpi sge, %35, %44 : vector<1x128xi32>
    %46 = arith.extui %45 : vector<1x128xi1> to vector<1x128xi32>
    %47 = arith.addi %37, %46 : vector<1x128xi32>
    %c1 = arith.constant 1 : index
    %48 = memref.load %arg2[%c1] : memref<2xi32, #tpu.memory_space<smem>>
    %49 = vector.broadcast %48 : i32 to vector<16x1xi32>
    %50 = arith.cmpi sge, %31, %49 : vector<16x1xi32>
    %51 = arith.extui %50 : vector<16x1xi1> to vector<16x1xi32>
    %52 = arith.addi %42, %51 : vector<16x1xi32>
    %c1_8 = arith.constant 1 : index
    %53 = memref.load %arg3[%c1_8] : memref<2xi32, #tpu.memory_space<smem>>
    %54 = vector.broadcast %53 : i32 to vector<1x128xi32>
    %55 = arith.cmpi sge, %35, %54 : vector<1x128xi32>
    %56 = arith.extui %55 : vector<1x128xi1> to vector<1x128xi32>
    %57 = arith.addi %47, %56 : vector<1x128xi32>
    %58 = tpu.iota {dimensions = array<i32: 1>} : vector<1x128xi32>
    %59 = tpu.bitcast %27 : vector<16x128xf32> -> vector<16x128xi32>
    %c-128_i32 = arith.constant -128 : i32
    %60 = vector.broadcast %c-128_i32 : i32 to vector<16x128xi32>
    %61 = arith.andi %59, %60 : vector<16x128xi32>
    %62 = vector.broadcast %58 : vector<1x128xi32> to vector<16x128xi32>
    %63 = arith.ori %61, %62 : vector<16x128xi32>
    %64 = vector.broadcast %52 : vector<16x1xi32> to vector<16x128xi32>
    %65 = vector.broadcast %57 : vector<1x128xi32> to vector<16x128xi32>
    %66 = arith.cmpi eq, %64, %65 : vector<16x128xi32>
    %c2147483647_i32 = arith.constant 2147483647 : i32
    %67 = vector.broadcast %c2147483647_i32 : i32 to vector<16x128xi32>
    %68 = arith.select %66, %63, %67 : vector<16x128xi1>, vector<16x128xi32>
    %c0_9 = arith.constant 0 : index
    %c0_10 = arith.constant 0 : index
    %69 = vector.load %arg7[%c0_9, %c0_10] : memref<16x16xi32, #tpu.memory_space<vmem>>, vector<16x16xi32>
    %c0_11 = arith.constant 0 : index
    %c0_12 = arith.constant 0 : index
    %70 = vector.load %arg8[%c0_11, %c0_12] : memref<16x16xi32, #tpu.memory_space<vmem>>, vector<16x16xi32>
    %cst_13 = arith.constant dense<2147483647> : vector<16xi32>
    %71 = vector.multi_reduction <minsi>, %68, %cst_13 [1] : vector<16x128xi32> to vector<16xi32>
    %72 = vector.shape_cast %71 : vector<16xi32> to vector<16x1xi32>
    %c127_i32 = arith.constant 127 : i32
    %73 = vector.broadcast %c127_i32 : i32 to vector<16x1xi32>
    %74 = arith.andi %72, %73 : vector<16x1xi32>
    %c-128_i32_14 = arith.constant -128 : i32
    %75 = vector.broadcast %c-128_i32_14 : i32 to vector<16x1xi32>
    %76 = arith.andi %72, %75 : vector<16x1xi32>
    %c128_i32_15 = arith.constant 128 : i32
    %77 = arith.muli %arg1, %c128_i32_15 : i32
    %78 = vector.broadcast %77 : i32 to vector<16x1xi32>
    %79 = arith.addi %74, %78 : vector<16x1xi32>
    %80 = vector.broadcast %58 : vector<1x128xi32> to vector<16x128xi32>
    %81 = vector.broadcast %74 : vector<16x1xi32> to vector<16x128xi32>
    %82 = arith.cmpi eq, %80, %81 : vector<16x128xi32>
    %c2147483647_i32_16 = arith.constant 2147483647 : i32
    %83 = vector.broadcast %c2147483647_i32_16 : i32 to vector<16x128xi32>
    %84 = arith.select %82, %83, %68 : vector<16x128xi1>, vector<16x128xi32>
    %cst_17 = arith.constant dense<-2147483648> : vector<16xi32>
    %85 = vector.multi_reduction <maxsi>, %69, %cst_17 [1] : vector<16x16xi32> to vector<16xi32>
    %86 = vector.shape_cast %85 : vector<16xi32> to vector<16x1xi32>
    %c15_i32 = arith.constant 15 : i32
    %87 = vector.broadcast %c15_i32 : i32 to vector<16x1xi32>
    %88 = arith.andi %86, %87 : vector<16x1xi32>
    %89 = vector.broadcast %88 : vector<16x1xi32> to vector<16x16xi32>
    %90 = arith.cmpi eq, %0, %89 : vector<16x16xi32>
    %91 = arith.cmpi slt, %76, %86 : vector<16x1xi32>
    %92 = vector.broadcast %91 : vector<16x1xi1> to vector<16x16xi1>
    %93 = arith.andi %90, %92 : vector<16x16xi1>
    %94 = vector.broadcast %76 : vector<16x1xi32> to vector<16x16xi32>
    %95 = arith.ori %94, %0 : vector<16x16xi32>
    %96 = arith.select %93, %95, %69 : vector<16x16xi1>, vector<16x16xi32>
    %97 = vector.shape_cast %79 : vector<16x1xi32> to vector<16x1xi32>
    %98 = vector.broadcast %97 : vector<16x1xi32> to vector<16x16xi32>
    %99 = arith.select %93, %98, %70 : vector<16x16xi1>, vector<16x16xi32>
    %cst_18 = arith.constant dense<2147483647> : vector<16xi32>
    %100 = vector.multi_reduction <minsi>, %84, %cst_18 [1] : vector<16x128xi32> to vector<16xi32>
    %101 = vector.shape_cast %100 : vector<16xi32> to vector<16x1xi32>
    %c127_i32_19 = arith.constant 127 : i32
    %102 = vector.broadcast %c127_i32_19 : i32 to vector<16x1xi32>
    %103 = arith.andi %101, %102 : vector<16x1xi32>
    %c-128_i32_20 = arith.constant -128 : i32
    %104 = vector.broadcast %c-128_i32_20 : i32 to vector<16x1xi32>
    %105 = arith.andi %101, %104 : vector<16x1xi32>
    %c128_i32_21 = arith.constant 128 : i32
    %106 = arith.muli %arg1, %c128_i32_21 : i32
    %107 = vector.broadcast %106 : i32 to vector<16x1xi32>
    %108 = arith.addi %103, %107 : vector<16x1xi32>
    %109 = vector.broadcast %58 : vector<1x128xi32> to vector<16x128xi32>
    %110 = vector.broadcast %103 : vector<16x1xi32> to vector<16x128xi32>
    %111 = arith.cmpi eq, %109, %110 : vector<16x128xi32>
    %c2147483647_i32_22 = arith.constant 2147483647 : i32
    %112 = vector.broadcast %c2147483647_i32_22 : i32 to vector<16x128xi32>
    %113 = arith.select %111, %112, %84 : vector<16x128xi1>, vector<16x128xi32>
    %cst_23 = arith.constant dense<-2147483648> : vector<16xi32>
    %114 = vector.multi_reduction <maxsi>, %96, %cst_23 [1] : vector<16x16xi32> to vector<16xi32>
    %115 = vector.shape_cast %114 : vector<16xi32> to vector<16x1xi32>
    %c15_i32_24 = arith.constant 15 : i32
    %116 = vector.broadcast %c15_i32_24 : i32 to vector<16x1xi32>
    %117 = arith.andi %115, %116 : vector<16x1xi32>
    %118 = vector.broadcast %117 : vector<16x1xi32> to vector<16x16xi32>
    %119 = arith.cmpi eq, %0, %118 : vector<16x16xi32>
    %120 = arith.cmpi slt, %105, %115 : vector<16x1xi32>
    %121 = vector.broadcast %120 : vector<16x1xi1> to vector<16x16xi1>
    %122 = arith.andi %119, %121 : vector<16x16xi1>
    %123 = vector.broadcast %105 : vector<16x1xi32> to vector<16x16xi32>
    %124 = arith.ori %123, %0 : vector<16x16xi32>
    %125 = arith.select %122, %124, %96 : vector<16x16xi1>, vector<16x16xi32>
    %126 = vector.shape_cast %108 : vector<16x1xi32> to vector<16x1xi32>
    %127 = vector.broadcast %126 : vector<16x1xi32> to vector<16x16xi32>
    %128 = arith.select %122, %127, %99 : vector<16x16xi1>, vector<16x16xi32>
    %cst_25 = arith.constant dense<2147483647> : vector<16xi32>
    %129 = vector.multi_reduction <minsi>, %113, %cst_25 [1] : vector<16x128xi32> to vector<16xi32>
    %130 = vector.shape_cast %129 : vector<16xi32> to vector<16x1xi32>
    %c127_i32_26 = arith.constant 127 : i32
    %131 = vector.broadcast %c127_i32_26 : i32 to vector<16x1xi32>
    %132 = arith.andi %130, %131 : vector<16x1xi32>
    %c-128_i32_27 = arith.constant -128 : i32
    %133 = vector.broadcast %c-128_i32_27 : i32 to vector<16x1xi32>
    %134 = arith.andi %130, %133 : vector<16x1xi32>
    %c128_i32_28 = arith.constant 128 : i32
    %135 = arith.muli %arg1, %c128_i32_28 : i32
    %136 = vector.broadcast %135 : i32 to vector<16x1xi32>
    %137 = arith.addi %132, %136 : vector<16x1xi32>
    %138 = vector.broadcast %58 : vector<1x128xi32> to vector<16x128xi32>
    %139 = vector.broadcast %132 : vector<16x1xi32> to vector<16x128xi32>
    %140 = arith.cmpi eq, %138, %139 : vector<16x128xi32>
    %c2147483647_i32_29 = arith.constant 2147483647 : i32
    %141 = vector.broadcast %c2147483647_i32_29 : i32 to vector<16x128xi32>
    %142 = arith.select %140, %141, %113 : vector<16x128xi1>, vector<16x128xi32>
    %cst_30 = arith.constant dense<-2147483648> : vector<16xi32>
    %143 = vector.multi_reduction <maxsi>, %125, %cst_30 [1] : vector<16x16xi32> to vector<16xi32>
    %144 = vector.shape_cast %143 : vector<16xi32> to vector<16x1xi32>
    %c15_i32_31 = arith.constant 15 : i32
    %145 = vector.broadcast %c15_i32_31 : i32 to vector<16x1xi32>
    %146 = arith.andi %144, %145 : vector<16x1xi32>
    %147 = vector.broadcast %146 : vector<16x1xi32> to vector<16x16xi32>
    %148 = arith.cmpi eq, %0, %147 : vector<16x16xi32>
    %149 = arith.cmpi slt, %134, %144 : vector<16x1xi32>
    %150 = vector.broadcast %149 : vector<16x1xi1> to vector<16x16xi1>
    %151 = arith.andi %148, %150 : vector<16x16xi1>
    %152 = vector.broadcast %134 : vector<16x1xi32> to vector<16x16xi32>
    %153 = arith.ori %152, %0 : vector<16x16xi32>
    %154 = arith.select %151, %153, %125 : vector<16x16xi1>, vector<16x16xi32>
    %155 = vector.shape_cast %137 : vector<16x1xi32> to vector<16x1xi32>
    %156 = vector.broadcast %155 : vector<16x1xi32> to vector<16x16xi32>
    %157 = arith.select %151, %156, %128 : vector<16x16xi1>, vector<16x16xi32>
    %cst_32 = arith.constant dense<2147483647> : vector<16xi32>
    %158 = vector.multi_reduction <minsi>, %142, %cst_32 [1] : vector<16x128xi32> to vector<16xi32>
    %159 = vector.shape_cast %158 : vector<16xi32> to vector<16x1xi32>
    %c127_i32_33 = arith.constant 127 : i32
    %160 = vector.broadcast %c127_i32_33 : i32 to vector<16x1xi32>
    %161 = arith.andi %159, %160 : vector<16x1xi32>
    %c-128_i32_34 = arith.constant -128 : i32
    %162 = vector.broadcast %c-128_i32_34 : i32 to vector<16x1xi32>
    %163 = arith.andi %159, %162 : vector<16x1xi32>
    %c128_i32_35 = arith.constant 128 : i32
    %164 = arith.muli %arg1, %c128_i32_35 : i32
    %165 = vector.broadcast %164 : i32 to vector<16x1xi32>
    %166 = arith.addi %161, %165 : vector<16x1xi32>
    %167 = vector.broadcast %58 : vector<1x128xi32> to vector<16x128xi32>
    %168 = vector.broadcast %161 : vector<16x1xi32> to vector<16x128xi32>
    %169 = arith.cmpi eq, %167, %168 : vector<16x128xi32>
    %c2147483647_i32_36 = arith.constant 2147483647 : i32
    %170 = vector.broadcast %c2147483647_i32_36 : i32 to vector<16x128xi32>
    %171 = arith.select %169, %170, %142 : vector<16x128xi1>, vector<16x128xi32>
    %cst_37 = arith.constant dense<-2147483648> : vector<16xi32>
    %172 = vector.multi_reduction <maxsi>, %154, %cst_37 [1] : vector<16x16xi32> to vector<16xi32>
    %173 = vector.shape_cast %172 : vector<16xi32> to vector<16x1xi32>
    %c15_i32_38 = arith.constant 15 : i32
    %174 = vector.broadcast %c15_i32_38 : i32 to vector<16x1xi32>
    %175 = arith.andi %173, %174 : vector<16x1xi32>
    %176 = vector.broadcast %175 : vector<16x1xi32> to vector<16x16xi32>
    %177 = arith.cmpi eq, %0, %176 : vector<16x16xi32>
    %178 = arith.cmpi slt, %163, %173 : vector<16x1xi32>
    %179 = vector.broadcast %178 : vector<16x1xi1> to vector<16x16xi1>
    %180 = arith.andi %177, %179 : vector<16x16xi1>
    %181 = vector.broadcast %163 : vector<16x1xi32> to vector<16x16xi32>
    %182 = arith.ori %181, %0 : vector<16x16xi32>
    %183 = arith.select %180, %182, %154 : vector<16x16xi1>, vector<16x16xi32>
    %184 = vector.shape_cast %166 : vector<16x1xi32> to vector<16x1xi32>
    %185 = vector.broadcast %184 : vector<16x1xi32> to vector<16x16xi32>
    %186 = arith.select %180, %185, %157 : vector<16x16xi1>, vector<16x16xi32>
    %cst_39 = arith.constant dense<2147483647> : vector<16xi32>
    %187 = vector.multi_reduction <minsi>, %171, %cst_39 [1] : vector<16x128xi32> to vector<16xi32>
    %188 = vector.shape_cast %187 : vector<16xi32> to vector<16x1xi32>
    %c127_i32_40 = arith.constant 127 : i32
    %189 = vector.broadcast %c127_i32_40 : i32 to vector<16x1xi32>
    %190 = arith.andi %188, %189 : vector<16x1xi32>
    %c-128_i32_41 = arith.constant -128 : i32
    %191 = vector.broadcast %c-128_i32_41 : i32 to vector<16x1xi32>
    %192 = arith.andi %188, %191 : vector<16x1xi32>
    %c128_i32_42 = arith.constant 128 : i32
    %193 = arith.muli %arg1, %c128_i32_42 : i32
    %194 = vector.broadcast %193 : i32 to vector<16x1xi32>
    %195 = arith.addi %190, %194 : vector<16x1xi32>
    %196 = vector.broadcast %58 : vector<1x128xi32> to vector<16x128xi32>
    %197 = vector.broadcast %190 : vector<16x1xi32> to vector<16x128xi32>
    %198 = arith.cmpi eq, %196, %197 : vector<16x128xi32>
    %c2147483647_i32_43 = arith.constant 2147483647 : i32
    %199 = vector.broadcast %c2147483647_i32_43 : i32 to vector<16x128xi32>
    %200 = arith.select %198, %199, %171 : vector<16x128xi1>, vector<16x128xi32>
    %cst_44 = arith.constant dense<-2147483648> : vector<16xi32>
    %201 = vector.multi_reduction <maxsi>, %183, %cst_44 [1] : vector<16x16xi32> to vector<16xi32>
    %202 = vector.shape_cast %201 : vector<16xi32> to vector<16x1xi32>
    %c15_i32_45 = arith.constant 15 : i32
    %203 = vector.broadcast %c15_i32_45 : i32 to vector<16x1xi32>
    %204 = arith.andi %202, %203 : vector<16x1xi32>
    %205 = vector.broadcast %204 : vector<16x1xi32> to vector<16x16xi32>
    %206 = arith.cmpi eq, %0, %205 : vector<16x16xi32>
    %207 = arith.cmpi slt, %192, %202 : vector<16x1xi32>
    %208 = vector.broadcast %207 : vector<16x1xi1> to vector<16x16xi1>
    %209 = arith.andi %206, %208 : vector<16x16xi1>
    %210 = vector.broadcast %192 : vector<16x1xi32> to vector<16x16xi32>
    %211 = arith.ori %210, %0 : vector<16x16xi32>
    %212 = arith.select %209, %211, %183 : vector<16x16xi1>, vector<16x16xi32>
    %213 = vector.shape_cast %195 : vector<16x1xi32> to vector<16x1xi32>
    %214 = vector.broadcast %213 : vector<16x1xi32> to vector<16x16xi32>
    %215 = arith.select %209, %214, %186 : vector<16x16xi1>, vector<16x16xi32>
    %cst_46 = arith.constant dense<2147483647> : vector<16xi32>
    %216 = vector.multi_reduction <minsi>, %200, %cst_46 [1] : vector<16x128xi32> to vector<16xi32>
    %217 = vector.shape_cast %216 : vector<16xi32> to vector<16x1xi32>
    %c127_i32_47 = arith.constant 127 : i32
    %218 = vector.broadcast %c127_i32_47 : i32 to vector<16x1xi32>
    %219 = arith.andi %217, %218 : vector<16x1xi32>
    %c-128_i32_48 = arith.constant -128 : i32
    %220 = vector.broadcast %c-128_i32_48 : i32 to vector<16x1xi32>
    %221 = arith.andi %217, %220 : vector<16x1xi32>
    %c128_i32_49 = arith.constant 128 : i32
    %222 = arith.muli %arg1, %c128_i32_49 : i32
    %223 = vector.broadcast %222 : i32 to vector<16x1xi32>
    %224 = arith.addi %219, %223 : vector<16x1xi32>
    %225 = vector.broadcast %58 : vector<1x128xi32> to vector<16x128xi32>
    %226 = vector.broadcast %219 : vector<16x1xi32> to vector<16x128xi32>
    %227 = arith.cmpi eq, %225, %226 : vector<16x128xi32>
    %c2147483647_i32_50 = arith.constant 2147483647 : i32
    %228 = vector.broadcast %c2147483647_i32_50 : i32 to vector<16x128xi32>
    %229 = arith.select %227, %228, %200 : vector<16x128xi1>, vector<16x128xi32>
    %cst_51 = arith.constant dense<-2147483648> : vector<16xi32>
    %230 = vector.multi_reduction <maxsi>, %212, %cst_51 [1] : vector<16x16xi32> to vector<16xi32>
    %231 = vector.shape_cast %230 : vector<16xi32> to vector<16x1xi32>
    %c15_i32_52 = arith.constant 15 : i32
    %232 = vector.broadcast %c15_i32_52 : i32 to vector<16x1xi32>
    %233 = arith.andi %231, %232 : vector<16x1xi32>
    %234 = vector.broadcast %233 : vector<16x1xi32> to vector<16x16xi32>
    %235 = arith.cmpi eq, %0, %234 : vector<16x16xi32>
    %236 = arith.cmpi slt, %221, %231 : vector<16x1xi32>
    %237 = vector.broadcast %236 : vector<16x1xi1> to vector<16x16xi1>
    %238 = arith.andi %235, %237 : vector<16x16xi1>
    %239 = vector.broadcast %221 : vector<16x1xi32> to vector<16x16xi32>
    %240 = arith.ori %239, %0 : vector<16x16xi32>
    %241 = arith.select %238, %240, %212 : vector<16x16xi1>, vector<16x16xi32>
    %242 = vector.shape_cast %224 : vector<16x1xi32> to vector<16x1xi32>
    %243 = vector.broadcast %242 : vector<16x1xi32> to vector<16x16xi32>
    %244 = arith.select %238, %243, %215 : vector<16x16xi1>, vector<16x16xi32>
    %cst_53 = arith.constant dense<2147483647> : vector<16xi32>
    %245 = vector.multi_reduction <minsi>, %229, %cst_53 [1] : vector<16x128xi32> to vector<16xi32>
    %246 = vector.shape_cast %245 : vector<16xi32> to vector<16x1xi32>
    %c127_i32_54 = arith.constant 127 : i32
    %247 = vector.broadcast %c127_i32_54 : i32 to vector<16x1xi32>
    %248 = arith.andi %246, %247 : vector<16x1xi32>
    %c-128_i32_55 = arith.constant -128 : i32
    %249 = vector.broadcast %c-128_i32_55 : i32 to vector<16x1xi32>
    %250 = arith.andi %246, %249 : vector<16x1xi32>
    %c128_i32_56 = arith.constant 128 : i32
    %251 = arith.muli %arg1, %c128_i32_56 : i32
    %252 = vector.broadcast %251 : i32 to vector<16x1xi32>
    %253 = arith.addi %248, %252 : vector<16x1xi32>
    %254 = vector.broadcast %58 : vector<1x128xi32> to vector<16x128xi32>
    %255 = vector.broadcast %248 : vector<16x1xi32> to vector<16x128xi32>
    %256 = arith.cmpi eq, %254, %255 : vector<16x128xi32>
    %c2147483647_i32_57 = arith.constant 2147483647 : i32
    %257 = vector.broadcast %c2147483647_i32_57 : i32 to vector<16x128xi32>
    %258 = arith.select %256, %257, %229 : vector<16x128xi1>, vector<16x128xi32>
    %cst_58 = arith.constant dense<-2147483648> : vector<16xi32>
    %259 = vector.multi_reduction <maxsi>, %241, %cst_58 [1] : vector<16x16xi32> to vector<16xi32>
    %260 = vector.shape_cast %259 : vector<16xi32> to vector<16x1xi32>
    %c15_i32_59 = arith.constant 15 : i32
    %261 = vector.broadcast %c15_i32_59 : i32 to vector<16x1xi32>
    %262 = arith.andi %260, %261 : vector<16x1xi32>
    %263 = vector.broadcast %262 : vector<16x1xi32> to vector<16x16xi32>
    %264 = arith.cmpi eq, %0, %263 : vector<16x16xi32>
    %265 = arith.cmpi slt, %250, %260 : vector<16x1xi32>
    %266 = vector.broadcast %265 : vector<16x1xi1> to vector<16x16xi1>
    %267 = arith.andi %264, %266 : vector<16x16xi1>
    %268 = vector.broadcast %250 : vector<16x1xi32> to vector<16x16xi32>
    %269 = arith.ori %268, %0 : vector<16x16xi32>
    %270 = arith.select %267, %269, %241 : vector<16x16xi1>, vector<16x16xi32>
    %271 = vector.shape_cast %253 : vector<16x1xi32> to vector<16x1xi32>
    %272 = vector.broadcast %271 : vector<16x1xi32> to vector<16x16xi32>
    %273 = arith.select %267, %272, %244 : vector<16x16xi1>, vector<16x16xi32>
    %cst_60 = arith.constant dense<2147483647> : vector<16xi32>
    %274 = vector.multi_reduction <minsi>, %258, %cst_60 [1] : vector<16x128xi32> to vector<16xi32>
    %275 = vector.shape_cast %274 : vector<16xi32> to vector<16x1xi32>
    %c127_i32_61 = arith.constant 127 : i32
    %276 = vector.broadcast %c127_i32_61 : i32 to vector<16x1xi32>
    %277 = arith.andi %275, %276 : vector<16x1xi32>
    %c-128_i32_62 = arith.constant -128 : i32
    %278 = vector.broadcast %c-128_i32_62 : i32 to vector<16x1xi32>
    %279 = arith.andi %275, %278 : vector<16x1xi32>
    %c128_i32_63 = arith.constant 128 : i32
    %280 = arith.muli %arg1, %c128_i32_63 : i32
    %281 = vector.broadcast %280 : i32 to vector<16x1xi32>
    %282 = arith.addi %277, %281 : vector<16x1xi32>
    %283 = vector.broadcast %58 : vector<1x128xi32> to vector<16x128xi32>
    %284 = vector.broadcast %277 : vector<16x1xi32> to vector<16x128xi32>
    %285 = arith.cmpi eq, %283, %284 : vector<16x128xi32>
    %c2147483647_i32_64 = arith.constant 2147483647 : i32
    %286 = vector.broadcast %c2147483647_i32_64 : i32 to vector<16x128xi32>
    %287 = arith.select %285, %286, %258 : vector<16x128xi1>, vector<16x128xi32>
    %cst_65 = arith.constant dense<-2147483648> : vector<16xi32>
    %288 = vector.multi_reduction <maxsi>, %270, %cst_65 [1] : vector<16x16xi32> to vector<16xi32>
    %289 = vector.shape_cast %288 : vector<16xi32> to vector<16x1xi32>
    %c15_i32_66 = arith.constant 15 : i32
    %290 = vector.broadcast %c15_i32_66 : i32 to vector<16x1xi32>
    %291 = arith.andi %289, %290 : vector<16x1xi32>
    %292 = vector.broadcast %291 : vector<16x1xi32> to vector<16x16xi32>
    %293 = arith.cmpi eq, %0, %292 : vector<16x16xi32>
    %294 = arith.cmpi slt, %279, %289 : vector<16x1xi32>
    %295 = vector.broadcast %294 : vector<16x1xi1> to vector<16x16xi1>
    %296 = arith.andi %293, %295 : vector<16x16xi1>
    %297 = vector.broadcast %279 : vector<16x1xi32> to vector<16x16xi32>
    %298 = arith.ori %297, %0 : vector<16x16xi32>
    %299 = arith.select %296, %298, %270 : vector<16x16xi1>, vector<16x16xi32>
    %300 = vector.shape_cast %282 : vector<16x1xi32> to vector<16x1xi32>
    %301 = vector.broadcast %300 : vector<16x1xi32> to vector<16x16xi32>
    %302 = arith.select %296, %301, %273 : vector<16x16xi1>, vector<16x16xi32>
    %cst_67 = arith.constant dense<2147483647> : vector<16xi32>
    %303 = vector.multi_reduction <minsi>, %287, %cst_67 [1] : vector<16x128xi32> to vector<16xi32>
    %304 = vector.shape_cast %303 : vector<16xi32> to vector<16x1xi32>
    %c127_i32_68 = arith.constant 127 : i32
    %305 = vector.broadcast %c127_i32_68 : i32 to vector<16x1xi32>
    %306 = arith.andi %304, %305 : vector<16x1xi32>
    %c-128_i32_69 = arith.constant -128 : i32
    %307 = vector.broadcast %c-128_i32_69 : i32 to vector<16x1xi32>
    %308 = arith.andi %304, %307 : vector<16x1xi32>
    %c128_i32_70 = arith.constant 128 : i32
    %309 = arith.muli %arg1, %c128_i32_70 : i32
    %310 = vector.broadcast %309 : i32 to vector<16x1xi32>
    %311 = arith.addi %306, %310 : vector<16x1xi32>
    %312 = vector.broadcast %58 : vector<1x128xi32> to vector<16x128xi32>
    %313 = vector.broadcast %306 : vector<16x1xi32> to vector<16x128xi32>
    %314 = arith.cmpi eq, %312, %313 : vector<16x128xi32>
    %c2147483647_i32_71 = arith.constant 2147483647 : i32
    %315 = vector.broadcast %c2147483647_i32_71 : i32 to vector<16x128xi32>
    %316 = arith.select %314, %315, %287 : vector<16x128xi1>, vector<16x128xi32>
    %cst_72 = arith.constant dense<-2147483648> : vector<16xi32>
    %317 = vector.multi_reduction <maxsi>, %299, %cst_72 [1] : vector<16x16xi32> to vector<16xi32>
    %318 = vector.shape_cast %317 : vector<16xi32> to vector<16x1xi32>
    %c15_i32_73 = arith.constant 15 : i32
    %319 = vector.broadcast %c15_i32_73 : i32 to vector<16x1xi32>
    %320 = arith.andi %318, %319 : vector<16x1xi32>
    %321 = vector.broadcast %320 : vector<16x1xi32> to vector<16x16xi32>
    %322 = arith.cmpi eq, %0, %321 : vector<16x16xi32>
    %323 = arith.cmpi slt, %308, %318 : vector<16x1xi32>
    %324 = vector.broadcast %323 : vector<16x1xi1> to vector<16x16xi1>
    %325 = arith.andi %322, %324 : vector<16x16xi1>
    %326 = vector.broadcast %308 : vector<16x1xi32> to vector<16x16xi32>
    %327 = arith.ori %326, %0 : vector<16x16xi32>
    %328 = arith.select %325, %327, %299 : vector<16x16xi1>, vector<16x16xi32>
    %329 = vector.shape_cast %311 : vector<16x1xi32> to vector<16x1xi32>
    %330 = vector.broadcast %329 : vector<16x1xi32> to vector<16x16xi32>
    %331 = arith.select %325, %330, %302 : vector<16x16xi1>, vector<16x16xi32>
    %cst_74 = arith.constant dense<2147483647> : vector<16xi32>
    %332 = vector.multi_reduction <minsi>, %316, %cst_74 [1] : vector<16x128xi32> to vector<16xi32>
    %333 = vector.shape_cast %332 : vector<16xi32> to vector<16x1xi32>
    %c127_i32_75 = arith.constant 127 : i32
    %334 = vector.broadcast %c127_i32_75 : i32 to vector<16x1xi32>
    %335 = arith.andi %333, %334 : vector<16x1xi32>
    %c-128_i32_76 = arith.constant -128 : i32
    %336 = vector.broadcast %c-128_i32_76 : i32 to vector<16x1xi32>
    %337 = arith.andi %333, %336 : vector<16x1xi32>
    %c128_i32_77 = arith.constant 128 : i32
    %338 = arith.muli %arg1, %c128_i32_77 : i32
    %339 = vector.broadcast %338 : i32 to vector<16x1xi32>
    %340 = arith.addi %335, %339 : vector<16x1xi32>
    %341 = vector.broadcast %58 : vector<1x128xi32> to vector<16x128xi32>
    %342 = vector.broadcast %335 : vector<16x1xi32> to vector<16x128xi32>
    %343 = arith.cmpi eq, %341, %342 : vector<16x128xi32>
    %c2147483647_i32_78 = arith.constant 2147483647 : i32
    %344 = vector.broadcast %c2147483647_i32_78 : i32 to vector<16x128xi32>
    %345 = arith.select %343, %344, %316 : vector<16x128xi1>, vector<16x128xi32>
    %cst_79 = arith.constant dense<-2147483648> : vector<16xi32>
    %346 = vector.multi_reduction <maxsi>, %328, %cst_79 [1] : vector<16x16xi32> to vector<16xi32>
    %347 = vector.shape_cast %346 : vector<16xi32> to vector<16x1xi32>
    %c15_i32_80 = arith.constant 15 : i32
    %348 = vector.broadcast %c15_i32_80 : i32 to vector<16x1xi32>
    %349 = arith.andi %347, %348 : vector<16x1xi32>
    %350 = vector.broadcast %349 : vector<16x1xi32> to vector<16x16xi32>
    %351 = arith.cmpi eq, %0, %350 : vector<16x16xi32>
    %352 = arith.cmpi slt, %337, %347 : vector<16x1xi32>
    %353 = vector.broadcast %352 : vector<16x1xi1> to vector<16x16xi1>
    %354 = arith.andi %351, %353 : vector<16x16xi1>
    %355 = vector.broadcast %337 : vector<16x1xi32> to vector<16x16xi32>
    %356 = arith.ori %355, %0 : vector<16x16xi32>
    %357 = arith.select %354, %356, %328 : vector<16x16xi1>, vector<16x16xi32>
    %358 = vector.shape_cast %340 : vector<16x1xi32> to vector<16x1xi32>
    %359 = vector.broadcast %358 : vector<16x1xi32> to vector<16x16xi32>
    %360 = arith.select %354, %359, %331 : vector<16x16xi1>, vector<16x16xi32>
    %cst_81 = arith.constant dense<2147483647> : vector<16xi32>
    %361 = vector.multi_reduction <minsi>, %345, %cst_81 [1] : vector<16x128xi32> to vector<16xi32>
    %362 = vector.shape_cast %361 : vector<16xi32> to vector<16x1xi32>
    %c127_i32_82 = arith.constant 127 : i32
    %363 = vector.broadcast %c127_i32_82 : i32 to vector<16x1xi32>
    %364 = arith.andi %362, %363 : vector<16x1xi32>
    %c-128_i32_83 = arith.constant -128 : i32
    %365 = vector.broadcast %c-128_i32_83 : i32 to vector<16x1xi32>
    %366 = arith.andi %362, %365 : vector<16x1xi32>
    %c128_i32_84 = arith.constant 128 : i32
    %367 = arith.muli %arg1, %c128_i32_84 : i32
    %368 = vector.broadcast %367 : i32 to vector<16x1xi32>
    %369 = arith.addi %364, %368 : vector<16x1xi32>
    %370 = vector.broadcast %58 : vector<1x128xi32> to vector<16x128xi32>
    %371 = vector.broadcast %364 : vector<16x1xi32> to vector<16x128xi32>
    %372 = arith.cmpi eq, %370, %371 : vector<16x128xi32>
    %c2147483647_i32_85 = arith.constant 2147483647 : i32
    %373 = vector.broadcast %c2147483647_i32_85 : i32 to vector<16x128xi32>
    %374 = arith.select %372, %373, %345 : vector<16x128xi1>, vector<16x128xi32>
    %cst_86 = arith.constant dense<-2147483648> : vector<16xi32>
    %375 = vector.multi_reduction <maxsi>, %357, %cst_86 [1] : vector<16x16xi32> to vector<16xi32>
    %376 = vector.shape_cast %375 : vector<16xi32> to vector<16x1xi32>
    %c15_i32_87 = arith.constant 15 : i32
    %377 = vector.broadcast %c15_i32_87 : i32 to vector<16x1xi32>
    %378 = arith.andi %376, %377 : vector<16x1xi32>
    %379 = vector.broadcast %378 : vector<16x1xi32> to vector<16x16xi32>
    %380 = arith.cmpi eq, %0, %379 : vector<16x16xi32>
    %381 = arith.cmpi slt, %366, %376 : vector<16x1xi32>
    %382 = vector.broadcast %381 : vector<16x1xi1> to vector<16x16xi1>
    %383 = arith.andi %380, %382 : vector<16x16xi1>
    %384 = vector.broadcast %366 : vector<16x1xi32> to vector<16x16xi32>
    %385 = arith.ori %384, %0 : vector<16x16xi32>
    %386 = arith.select %383, %385, %357 : vector<16x16xi1>, vector<16x16xi32>
    %387 = vector.shape_cast %369 : vector<16x1xi32> to vector<16x1xi32>
    %388 = vector.broadcast %387 : vector<16x1xi32> to vector<16x16xi32>
    %389 = arith.select %383, %388, %360 : vector<16x16xi1>, vector<16x16xi32>
    %cst_88 = arith.constant dense<2147483647> : vector<16xi32>
    %390 = vector.multi_reduction <minsi>, %374, %cst_88 [1] : vector<16x128xi32> to vector<16xi32>
    %391 = vector.shape_cast %390 : vector<16xi32> to vector<16x1xi32>
    %c127_i32_89 = arith.constant 127 : i32
    %392 = vector.broadcast %c127_i32_89 : i32 to vector<16x1xi32>
    %393 = arith.andi %391, %392 : vector<16x1xi32>
    %c-128_i32_90 = arith.constant -128 : i32
    %394 = vector.broadcast %c-128_i32_90 : i32 to vector<16x1xi32>
    %395 = arith.andi %391, %394 : vector<16x1xi32>
    %c128_i32_91 = arith.constant 128 : i32
    %396 = arith.muli %arg1, %c128_i32_91 : i32
    %397 = vector.broadcast %396 : i32 to vector<16x1xi32>
    %398 = arith.addi %393, %397 : vector<16x1xi32>
    %399 = vector.broadcast %58 : vector<1x128xi32> to vector<16x128xi32>
    %400 = vector.broadcast %393 : vector<16x1xi32> to vector<16x128xi32>
    %401 = arith.cmpi eq, %399, %400 : vector<16x128xi32>
    %c2147483647_i32_92 = arith.constant 2147483647 : i32
    %402 = vector.broadcast %c2147483647_i32_92 : i32 to vector<16x128xi32>
    %403 = arith.select %401, %402, %374 : vector<16x128xi1>, vector<16x128xi32>
    %cst_93 = arith.constant dense<-2147483648> : vector<16xi32>
    %404 = vector.multi_reduction <maxsi>, %386, %cst_93 [1] : vector<16x16xi32> to vector<16xi32>
    %405 = vector.shape_cast %404 : vector<16xi32> to vector<16x1xi32>
    %c15_i32_94 = arith.constant 15 : i32
    %406 = vector.broadcast %c15_i32_94 : i32 to vector<16x1xi32>
    %407 = arith.andi %405, %406 : vector<16x1xi32>
    %408 = vector.broadcast %407 : vector<16x1xi32> to vector<16x16xi32>
    %409 = arith.cmpi eq, %0, %408 : vector<16x16xi32>
    %410 = arith.cmpi slt, %395, %405 : vector<16x1xi32>
    %411 = vector.broadcast %410 : vector<16x1xi1> to vector<16x16xi1>
    %412 = arith.andi %409, %411 : vector<16x16xi1>
    %413 = vector.broadcast %395 : vector<16x1xi32> to vector<16x16xi32>
    %414 = arith.ori %413, %0 : vector<16x16xi32>
    %415 = arith.select %412, %414, %386 : vector<16x16xi1>, vector<16x16xi32>
    %416 = vector.shape_cast %398 : vector<16x1xi32> to vector<16x1xi32>
    %417 = vector.broadcast %416 : vector<16x1xi32> to vector<16x16xi32>
    %418 = arith.select %412, %417, %389 : vector<16x16xi1>, vector<16x16xi32>
    %cst_95 = arith.constant dense<2147483647> : vector<16xi32>
    %419 = vector.multi_reduction <minsi>, %403, %cst_95 [1] : vector<16x128xi32> to vector<16xi32>
    %420 = vector.shape_cast %419 : vector<16xi32> to vector<16x1xi32>
    %c127_i32_96 = arith.constant 127 : i32
    %421 = vector.broadcast %c127_i32_96 : i32 to vector<16x1xi32>
    %422 = arith.andi %420, %421 : vector<16x1xi32>
    %c-128_i32_97 = arith.constant -128 : i32
    %423 = vector.broadcast %c-128_i32_97 : i32 to vector<16x1xi32>
    %424 = arith.andi %420, %423 : vector<16x1xi32>
    %c128_i32_98 = arith.constant 128 : i32
    %425 = arith.muli %arg1, %c128_i32_98 : i32
    %426 = vector.broadcast %425 : i32 to vector<16x1xi32>
    %427 = arith.addi %422, %426 : vector<16x1xi32>
    %428 = vector.broadcast %58 : vector<1x128xi32> to vector<16x128xi32>
    %429 = vector.broadcast %422 : vector<16x1xi32> to vector<16x128xi32>
    %430 = arith.cmpi eq, %428, %429 : vector<16x128xi32>
    %c2147483647_i32_99 = arith.constant 2147483647 : i32
    %431 = vector.broadcast %c2147483647_i32_99 : i32 to vector<16x128xi32>
    %432 = arith.select %430, %431, %403 : vector<16x128xi1>, vector<16x128xi32>
    %cst_100 = arith.constant dense<-2147483648> : vector<16xi32>
    %433 = vector.multi_reduction <maxsi>, %415, %cst_100 [1] : vector<16x16xi32> to vector<16xi32>
    %434 = vector.shape_cast %433 : vector<16xi32> to vector<16x1xi32>
    %c15_i32_101 = arith.constant 15 : i32
    %435 = vector.broadcast %c15_i32_101 : i32 to vector<16x1xi32>
    %436 = arith.andi %434, %435 : vector<16x1xi32>
    %437 = vector.broadcast %436 : vector<16x1xi32> to vector<16x16xi32>
    %438 = arith.cmpi eq, %0, %437 : vector<16x16xi32>
    %439 = arith.cmpi slt, %424, %434 : vector<16x1xi32>
    %440 = vector.broadcast %439 : vector<16x1xi1> to vector<16x16xi1>
    %441 = arith.andi %438, %440 : vector<16x16xi1>
    %442 = vector.broadcast %424 : vector<16x1xi32> to vector<16x16xi32>
    %443 = arith.ori %442, %0 : vector<16x16xi32>
    %444 = arith.select %441, %443, %415 : vector<16x16xi1>, vector<16x16xi32>
    %445 = vector.shape_cast %427 : vector<16x1xi32> to vector<16x1xi32>
    %446 = vector.broadcast %445 : vector<16x1xi32> to vector<16x16xi32>
    %447 = arith.select %441, %446, %418 : vector<16x16xi1>, vector<16x16xi32>
    %cst_102 = arith.constant dense<2147483647> : vector<16xi32>
    %448 = vector.multi_reduction <minsi>, %432, %cst_102 [1] : vector<16x128xi32> to vector<16xi32>
    %449 = vector.shape_cast %448 : vector<16xi32> to vector<16x1xi32>
    %c127_i32_103 = arith.constant 127 : i32
    %450 = vector.broadcast %c127_i32_103 : i32 to vector<16x1xi32>
    %451 = arith.andi %449, %450 : vector<16x1xi32>
    %c-128_i32_104 = arith.constant -128 : i32
    %452 = vector.broadcast %c-128_i32_104 : i32 to vector<16x1xi32>
    %453 = arith.andi %449, %452 : vector<16x1xi32>
    %c128_i32_105 = arith.constant 128 : i32
    %454 = arith.muli %arg1, %c128_i32_105 : i32
    %455 = vector.broadcast %454 : i32 to vector<16x1xi32>
    %456 = arith.addi %451, %455 : vector<16x1xi32>
    %457 = vector.broadcast %58 : vector<1x128xi32> to vector<16x128xi32>
    %458 = vector.broadcast %451 : vector<16x1xi32> to vector<16x128xi32>
    %459 = arith.cmpi eq, %457, %458 : vector<16x128xi32>
    %c2147483647_i32_106 = arith.constant 2147483647 : i32
    %460 = vector.broadcast %c2147483647_i32_106 : i32 to vector<16x128xi32>
    %461 = arith.select %459, %460, %432 : vector<16x128xi1>, vector<16x128xi32>
    %cst_107 = arith.constant dense<-2147483648> : vector<16xi32>
    %462 = vector.multi_reduction <maxsi>, %444, %cst_107 [1] : vector<16x16xi32> to vector<16xi32>
    %463 = vector.shape_cast %462 : vector<16xi32> to vector<16x1xi32>
    %c15_i32_108 = arith.constant 15 : i32
    %464 = vector.broadcast %c15_i32_108 : i32 to vector<16x1xi32>
    %465 = arith.andi %463, %464 : vector<16x1xi32>
    %466 = vector.broadcast %465 : vector<16x1xi32> to vector<16x16xi32>
    %467 = arith.cmpi eq, %0, %466 : vector<16x16xi32>
    %468 = arith.cmpi slt, %453, %463 : vector<16x1xi32>
    %469 = vector.broadcast %468 : vector<16x1xi1> to vector<16x16xi1>
    %470 = arith.andi %467, %469 : vector<16x16xi1>
    %471 = vector.broadcast %453 : vector<16x1xi32> to vector<16x16xi32>
    %472 = arith.ori %471, %0 : vector<16x16xi32>
    %473 = arith.select %470, %472, %444 : vector<16x16xi1>, vector<16x16xi32>
    %474 = vector.shape_cast %456 : vector<16x1xi32> to vector<16x1xi32>
    %475 = vector.broadcast %474 : vector<16x1xi32> to vector<16x16xi32>
    %476 = arith.select %470, %475, %447 : vector<16x16xi1>, vector<16x16xi32>
    %cst_109 = arith.constant dense<2147483647> : vector<16xi32>
    %477 = vector.multi_reduction <minsi>, %461, %cst_109 [1] : vector<16x128xi32> to vector<16xi32>
    %478 = vector.shape_cast %477 : vector<16xi32> to vector<16x1xi32>
    %c127_i32_110 = arith.constant 127 : i32
    %479 = vector.broadcast %c127_i32_110 : i32 to vector<16x1xi32>
    %480 = arith.andi %478, %479 : vector<16x1xi32>
    %c-128_i32_111 = arith.constant -128 : i32
    %481 = vector.broadcast %c-128_i32_111 : i32 to vector<16x1xi32>
    %482 = arith.andi %478, %481 : vector<16x1xi32>
    %c128_i32_112 = arith.constant 128 : i32
    %483 = arith.muli %arg1, %c128_i32_112 : i32
    %484 = vector.broadcast %483 : i32 to vector<16x1xi32>
    %485 = arith.addi %480, %484 : vector<16x1xi32>
    %486 = vector.broadcast %58 : vector<1x128xi32> to vector<16x128xi32>
    %487 = vector.broadcast %480 : vector<16x1xi32> to vector<16x128xi32>
    %488 = arith.cmpi eq, %486, %487 : vector<16x128xi32>
    %c2147483647_i32_113 = arith.constant 2147483647 : i32
    %489 = vector.broadcast %c2147483647_i32_113 : i32 to vector<16x128xi32>
    %490 = arith.select %488, %489, %461 : vector<16x128xi1>, vector<16x128xi32>
    %cst_114 = arith.constant dense<-2147483648> : vector<16xi32>
    %491 = vector.multi_reduction <maxsi>, %473, %cst_114 [1] : vector<16x16xi32> to vector<16xi32>
    %492 = vector.shape_cast %491 : vector<16xi32> to vector<16x1xi32>
    %c15_i32_115 = arith.constant 15 : i32
    %493 = vector.broadcast %c15_i32_115 : i32 to vector<16x1xi32>
    %494 = arith.andi %492, %493 : vector<16x1xi32>
    %495 = vector.broadcast %494 : vector<16x1xi32> to vector<16x16xi32>
    %496 = arith.cmpi eq, %0, %495 : vector<16x16xi32>
    %497 = arith.cmpi slt, %482, %492 : vector<16x1xi32>
    %498 = vector.broadcast %497 : vector<16x1xi1> to vector<16x16xi1>
    %499 = arith.andi %496, %498 : vector<16x16xi1>
    %500 = vector.broadcast %482 : vector<16x1xi32> to vector<16x16xi32>
    %501 = arith.ori %500, %0 : vector<16x16xi32>
    %502 = arith.select %499, %501, %473 : vector<16x16xi1>, vector<16x16xi32>
    %503 = vector.shape_cast %485 : vector<16x1xi32> to vector<16x1xi32>
    %504 = vector.broadcast %503 : vector<16x1xi32> to vector<16x16xi32>
    %505 = arith.select %499, %504, %476 : vector<16x16xi1>, vector<16x16xi32>
    %cst_116 = arith.constant dense<2147483647> : vector<16xi32>
    %506 = vector.multi_reduction <minsi>, %490, %cst_116 [1] : vector<16x128xi32> to vector<16xi32>
    %507 = vector.shape_cast %506 : vector<16xi32> to vector<16x1xi32>
    %c127_i32_117 = arith.constant 127 : i32
    %508 = vector.broadcast %c127_i32_117 : i32 to vector<16x1xi32>
    %509 = arith.andi %507, %508 : vector<16x1xi32>
    %c-128_i32_118 = arith.constant -128 : i32
    %510 = vector.broadcast %c-128_i32_118 : i32 to vector<16x1xi32>
    %511 = arith.andi %507, %510 : vector<16x1xi32>
    %c128_i32_119 = arith.constant 128 : i32
    %512 = arith.muli %arg1, %c128_i32_119 : i32
    %513 = vector.broadcast %512 : i32 to vector<16x1xi32>
    %514 = arith.addi %509, %513 : vector<16x1xi32>
    %cst_120 = arith.constant dense<-2147483648> : vector<16xi32>
    %515 = vector.multi_reduction <maxsi>, %502, %cst_120 [1] : vector<16x16xi32> to vector<16xi32>
    %516 = vector.shape_cast %515 : vector<16xi32> to vector<16x1xi32>
    %c15_i32_121 = arith.constant 15 : i32
    %517 = vector.broadcast %c15_i32_121 : i32 to vector<16x1xi32>
    %518 = arith.andi %516, %517 : vector<16x1xi32>
    %519 = vector.broadcast %518 : vector<16x1xi32> to vector<16x16xi32>
    %520 = arith.cmpi eq, %0, %519 : vector<16x16xi32>
    %521 = arith.cmpi slt, %511, %516 : vector<16x1xi32>
    %522 = vector.broadcast %521 : vector<16x1xi1> to vector<16x16xi1>
    %523 = arith.andi %520, %522 : vector<16x16xi1>
    %524 = vector.broadcast %511 : vector<16x1xi32> to vector<16x16xi32>
    %525 = arith.ori %524, %0 : vector<16x16xi32>
    %526 = arith.select %523, %525, %502 : vector<16x16xi1>, vector<16x16xi32>
    %527 = vector.shape_cast %514 : vector<16x1xi32> to vector<16x1xi32>
    %528 = vector.broadcast %527 : vector<16x1xi32> to vector<16x16xi32>
    %529 = arith.select %523, %528, %505 : vector<16x16xi1>, vector<16x16xi32>
    %c0_122 = arith.constant 0 : index
    %c0_123 = arith.constant 0 : index
    %530 = vector.load %arg7[%c0_122, %c0_123] : memref<16x16xi32, #tpu.memory_space<vmem>>, vector<16x16xi32>
    tpu.vector_store %arg7[%c0_122, %c0_123], %526 {strides = array<i32>} : memref<16x16xi32, #tpu.memory_space<vmem>>, vector<16x16xi32>,
    %c0_124 = arith.constant 0 : index
    %c0_125 = arith.constant 0 : index
    %531 = vector.load %arg8[%c0_124, %c0_125] : memref<16x16xi32, #tpu.memory_space<vmem>>, vector<16x16xi32>
    tpu.vector_store %arg8[%c0_124, %c0_125], %529 {strides = array<i32>} : memref<16x16xi32, #tpu.memory_space<vmem>>, vector<16x16xi32>,
    %c0_i32_126 = arith.constant 0 : i32
    %532 = arith.cmpi eq, %arg1, %c0_i32_126 : i32
    %533 = arith.extui %532 : i1 to i32
    %c0_i32_127 = arith.constant 0 : i32
    %534 = arith.cmpi ne, %533, %c0_i32_127 : i32
    scf.if %534 {
      %c0_128 = arith.constant 0 : index
      %c0_129 = arith.constant 0 : index
      %535 = vector.load %arg6[%c0_128, %c0_129] : memref<16x16xi32, #tpu.memory_space<vmem>>, vector<16x16xi32>
      tpu.vector_store %arg6[%c0_128, %c0_129], %529 {strides = array<i32>} : memref<16x16xi32, #tpu.memory_space<vmem>>, vector<16x16xi32>,
    } else {
    }
    return
  }
  func.func @transform_0(%arg0: i32, %arg1: i32, %arg2: memref<2xi32, #tpu.memory_space<smem>>, %arg3: memref<2xi32, #tpu.memory_space<smem>>) -> (i32, i32) {
    %c0_i32 = arith.constant 0 : i32
    %c0_i32_0 = arith.constant 0 : i32
    return %arg0, %c0_i32 : i32, i32
  }
  func.func @transform_1(%arg0: i32, %arg1: i32, %arg2: memref<2xi32, #tpu.memory_space<smem>>, %arg3: memref<2xi32, #tpu.memory_space<smem>>) -> (i32, i32) {
    %c0_i32 = arith.constant 0 : i32
    %c0_i32_0 = arith.constant 0 : i32
    return %c0_i32, %arg1 : i32, i32
  }
  func.func @transform_2(%arg0: i32, %arg1: i32, %arg2: memref<2xi32, #tpu.memory_space<smem>>, %arg3: memref<2xi32, #tpu.memory_space<smem>>) -> (i32, i32) {
    %c0_i32 = arith.constant 0 : i32
    %c0_i32_0 = arith.constant 0 : i32
    return %arg0, %c0_i32 : i32, i32
  }
}

</mosaic_0001>

<bundles_post_ra>
// kernel: tpu_custom_call.1
= control target key start
LH: loop header
LB: loop body
LE: loop exit
PB: predicated region body
PF: predicated region fallthrough
CT: control target
= control target key end

     0   :  { %s2184_s0 = inlined_call_operand.vmem [shape: s32[2], index: 0, kind: input, shape index: {}]   ;;  %s2185_s2 = inlined_call_operand.vmem [shape: f32[16,3], index: 2, kind: input, shape index: {}]   ;;  %s2186_s3 = inlined_call_operand.vmem [shape: f32[3,128], index: 3, kind: input, shape index: {}]   ;;  %s2187_s4 = inlined_call_operand.hbm [shape: s32[16,16], index: 4, kind: output, shape index: {}]   ;;  %s2188_s1 = inlined_call_operand.vmem [shape: s32[2], index: 1, kind: input, shape index: {}]  }
   0x1   :  { %s9_s17 = sshll.u32 %s2184_s0, 4  ;;  %s13_s20 = sshll.u32 %s2188_s1, 4  ;;  %s10_s17 = int_to_ptr.vmem [resolvable:$true] %s9_s17  ;;  %s14_s20 = int_to_ptr.vmem [resolvable:$true] %s13_s20 }
   0x2   :  { %s1554_s21 = scalar_lea.vmem %s10_s17, 16  ;;  %p1559_p1 = scmp.lt.s32.totalorder %s10_s17, %s10_s17 }
   0x3   :  { %p1555_p0 = scmp.ne.s32.totalorder %s10_s17, %s1554_s21  ;;  %p1560_p2 = scmp.lt.s32.totalorder %s1554_s21, %s1554_s21 }
   0x5   :  { %p1561_p3 = por %p1560_p2, %p1559_p1 }
   0x7   :  { %p1562_p4 = pnand %p1561_p3, %p1555_p0 }
   0x9   :  { %1565 = shalt.err (!%p1562_p4)  }
   0xa   :  { %s1604_s22 = smov [#allocation5]   ;;  %s1566_s23 = scalar_lea.vmem %s14_s20, 16 }
   0xb   :  { %12 = dma.vmem_to_smem %s10_s17, 16, %s1604_s22, [#allocation4] }
   0xc   :  { %p1567_p5 = scmp.ne.s32.totalorder %s14_s20, %s1566_s23  ;;  %p1571_p6 = scmp.lt.s32.totalorder %s14_s20, %s14_s20 }
   0xd   :  { %p1572_p7 = scmp.lt.s32.totalorder %s1566_s23, %s1566_s23 }
   0xf   :  { %p1573_p8 = por %p1572_p7, %p1571_p6 }
  0x11   :  { %p1574_p9 = pnand %p1573_p8, %p1567_p5 }
  0x13   :  { %1577 = shalt.err (!%p1574_p9)  }
  0x14   :  { %s1605_s0 = smov [#allocation6]  }
  0x15   :  { %16 = dma.vmem_to_smem %s14_s20, 16, %s1605_s0, [#allocation4] }
  0x16   :  { %1600 = dma.done.wait [#allocation4], 32 }
  0x17   :  { %1601 = vsyncadd [#allocation4], 4294967264 }
  0x18   :  { %18 = sfence }
  0x19   :  { %v36_v0 = vld [vmem:[%s2185_s2] sm:$0xff]  ;;  %v1606_v1 = vmov 1   ;;  %v1607_v2 = vmov 0  }
  0x1a   :  { %1551 = vset.pattern.permute.xlu1 %v1606_v1  ;;  %1550 = vset.pattern.permute.xlu0 %v1607_v2 }
  0x1b   :  { %19 = vsyncpa [#allocation8], 0  ;;  %60 = vperm.xlu1 %1551, %v36_v0   ;;  %41 = vperm.xlu0 %1550, %v36_v0   ;;  %v37_v3 = vld [vmem:[%s2185_s2 + $0x8] sm:$0xff]  ;;  %v24_v4 = vlaneseq  ;;  %s105_s27 = sld [smem:[#allocation5]]  ;;  %v1608_v5 = vmov 2   ;;  %s1540_s29 = sld [smem:[#allocation5 + $0x1]] }
  0x1c   :  { %s111_s28 = sld [smem:[#allocation6]]  ;;  %s1541_s30 = sld [smem:[#allocation6 + $0x1]]  ;;  %vm31_vm6 = vcmask 130048   ;;  %v38_v25 = vld [vmem:[%s2186_s3] sm:$0x7] }
  0x1d   :  { %v1649_v6 = vand.u32 127, %v24_v4  ;;  %v50_v7 = vshrl.u32 %v24_v4, 7  ;;  %34 = vst.msk [vmem:[#allocation3] sm:$0xff] %vm31_vm6, %v1607_v2  ;;  %35 = vst.msk [vmem:[#allocation3 + $0x8] sm:$0xff] %vm31_vm6, %v1607_v2  ;;  %s1609_s3 = smov [#allocation7]  }
  0x1e   :  { %s1529_s6 = sshll.u32 %s1609_s3, 4  ;;  %s2155_s6 = int_to_ptr.vmem [resolvable:$true] %s1529_s6 }
  0x1f   :  { %64 = vperm.xlu1 %1551, %v37_v3   ;;  %46 = vperm.xlu0 %1550, %v37_v3   ;;  %v98_v8 = vadd.s32 8, %v50_v7  ;;  %v30_v11 = vor.u32 2139095040, %v1649_v6  ;;  %v69_v23 = vsub.s32 1, %v50_v7  ;;  %v51_v24 = vsub.s32 0, %v50_v7  ;;  %s1578_s7 = scalar_lea.vmem %s2155_s6, 256  ;;  %p1583_p11 = scmp.lt.s32.totalorder %s2155_s6, %s2155_s6 }
  0x20   :  { %v87_v30 = vsub.s32 2, %v50_v7  ;;  %p1579_p10 = scmp.ne.s32.totalorder %s2155_s6, %s1578_s7  ;;  %p1584_p12 = scmp.lt.s32.totalorder %s1578_s7, %s1578_s7 }
  0x21   :  { %v106_v9 = vstv %s105_s27  ;;  %v116_v12 = vstv %s1540_s29  ;;  %33 = vst.msk [vmem:[#allocation2 + $0x8] sm:$0xff] %vm31_vm6, %v30_v11  ;;  %32 = vst.msk [vmem:[#allocation2] sm:$0xff] %vm31_vm6, %v30_v11  ;;  %v70_v27 = vrot.slane %v38_v25, %v69_v23  ;;  %v52_v29 = vrot.slane %v38_v25, %v51_v24 }
  0x22   :  { %v112_v10 = vstv %s111_s28  ;;  %vm108_vm0 = vcmp.ge.s32.totalorder %v98_v8, %v106_v9  ;;  %v124_v13 = vstv %s1541_s30  ;;  %vm118_vm2 = vcmp.ge.s32.totalorder %v98_v8, %v116_v12  ;;  %p1585_p13 = por %p1584_p12, %p1583_p11 }
  0x23   :  { %1553 = vset.pattern.permute.xlu1 %v1608_v5  ;;  %1552 = vset.pattern.permute.xlu0 %v1608_v5  ;;  %vm113_vm1 = vcmp.ge.s32.totalorder %v1649_v6, %v112_v10  ;;  %v110_v14 = vsel %vm108_vm0, 1, %v1607_v2  ;;  %vm125_vm3 = vcmp.ge.s32.totalorder %v1649_v6, %v124_v13  ;;  %v120_v16 = vsel %vm118_vm2, 1, %v1607_v2 }
  0x24   :  { %82 = vperm.xlu1 %1553, %v37_v3   ;;  %78 = vperm.xlu0 %1552, %v36_v0   ;;  %v114_v15 = vsel %vm113_vm1, 1, %v1607_v2  ;;  %v126_v17 = vsel %vm125_vm3, 1, %v1607_v2  ;;  %vm107_vm4 = vcmp.ge.s32.totalorder %v50_v7, %v106_v9  ;;  %vm117_vm5 = vcmp.ge.s32.totalorder %v50_v7, %v116_v12  ;;  %p1586_p0 = pnand %p1585_p13, %p1579_p10 }
  0x25   :  { %v122_v18 = vadd.s32 %v120_v16, %v110_v14  ;;  %v127_v19 = vadd.s32 %v126_v17, %v114_v15  ;;  %v109_v20 = vsel %vm107_vm4, 1, %v1607_v2  ;;  %v119_v21 = vsel %vm117_vm5, 1, %v1607_v2 }
  0x26   :  { %v121_v22 = vadd.s32 %v119_v21, %v109_v20  ;;  %v88_v37 = vrot.slane %v38_v25, %v87_v30 }
  0x27   :  { %vm135_vm7 = vcmp.eq.s32.totalorder %v122_v18, %v127_v19 }
  0x28   :  { %vm134_vm8 = vcmp.eq.s32.totalorder %v121_v22, %v127_v19  ;;  %v1661_v52 = vld [vmem:[#allocation2 + $0x8] sm:$0xff]  ;;  %v1663_v53 = vld [vmem:[#allocation2] sm:$0xff] }
  0x29   :  { %v196_v58 = vsel %vm31_vm6, %v1661_v52, 2147483648  ;;  %v181_v59 = vsel %vm31_vm6, %v1663_v53, 2147483648 }
  0x2a   :  { %v198_v0 = vshra.s32 %v196_v58, 16  ;;  %v183_v1 = vshra.s32 %v181_v59, 16  ;;  %v197_v9 = vand.u32 65535, %v196_v58  ;;  %v182_v10 = vand.u32 65535, %v181_v59  ;;  %v140_v59 = vld [vmem:[#allocation3] sm:$0xff] }
  0x2c   :  { %v200_v4 = vcvt.s32.f32 %v198_v0  ;;  %v185_v5 = vcvt.s32.f32 %v183_v1  ;;  %v199_v17 = vcvt.s32.f32 %v197_v9  ;;  %v184_v18 = vcvt.s32.f32 %v182_v10 }
  0x9a   :  { %v61_v26 = vpop.permute.xlu1 %60  ;;  %v42_v28 = vpop.permute.xlu0 %41 }
  0x9b   :  { %v71_v31 = vsub.f32 %v61_v26, %v70_v27  ;;  %v53_v32 = vsub.f32 %v42_v28, %v52_v29 }
  0x9d   :  { %v73_v38 = vmul.f32 %v71_v31, %v71_v31  ;;  %v55_v39 = vmul.f32 %v53_v32, %v53_v32 }
  0x9e   :  { %v65_v33 = vpop.permute.xlu1 %64  ;;  %v47_v34 = vpop.permute.xlu0 %46 }
  0x9f   :  { %v72_v35 = vsub.f32 %v65_v33, %v70_v27  ;;  %v54_v36 = vsub.f32 %v47_v34, %v52_v29  ;;  %v75_v46 = vadd.f32 %v73_v38, %v55_v39 }
  0xa1   :  { %v74_v40 = vmul.f32 %v72_v35, %v72_v35  ;;  %v56_v41 = vmul.f32 %v54_v36, %v54_v36 }
  0xa3   :  { %v83_v42 = vpop.permute.xlu1 %82  ;;  %v79_v43 = vpop.permute.xlu0 %78  ;;  %v76_v47 = vadd.f32 %v74_v40, %v56_v41 }
  0xa4   :  { %v90_v44 = vsub.f32 %v83_v42, %v88_v37  ;;  %v89_v45 = vsub.f32 %v79_v43, %v88_v37 }
  0xa6   :  { %v92_v48 = vmul.f32 %v90_v44, %v90_v44  ;;  %v91_v49 = vmul.f32 %v89_v45, %v89_v45 }
  0xa8   :  { %v94_v50 = vadd.f32 %v92_v48, %v76_v47  ;;  %v93_v51 = vadd.f32 %v91_v49, %v75_v46 }
  0xaa   :  { %v131_v54 = vand.u32 4294967168, %v94_v50  ;;  %v130_v55 = vand.u32 4294967168, %v93_v51 }
  0xac   :  { %v133_v56 = vor.u32 %v131_v54, %v1649_v6  ;;  %v132_v57 = vor.u32 %v130_v55, %v1649_v6 }
  0xae   :  { %v1672_v60 = vsel %vm135_vm7, %v133_v56, 2147483647  ;;  %v1675_v61 = vsel %vm134_vm8, %v132_v57, 2147483647  ;;  %v141_v57 = vld [vmem:[#allocation3 + $0x8] sm:$0xff] }
  0xaf   :  { %v157_v62 = vshra.s32 %v1672_v60, 16  ;;  %v143_v63 = vshra.s32 %v1675_v61, 16  ;;  %v156_v7 = vand.u32 65535, %v1672_v60  ;;  %v142_v8 = vand.u32 65535, %v1675_v61 }
  0xb1   :  { %v159_v2 = vcvt.s32.f32 %v157_v62  ;;  %v145_v3 = vcvt.s32.f32 %v143_v63  ;;  %v158_v13 = vcvt.s32.f32 %v156_v7  ;;  %v144_v14 = vcvt.s32.f32 %v142_v8 }
  0xb3   :  { %160 = vmin.xlane.f32.xlu0 %v159_v2  ;;  %146 = vmin.xlane.f32.xlu1 %v145_v3 }
  0xb7   :  { %201 = vmax.xlane.f32.xlu1 %v200_v4  ;;  %186 = vmax.xlane.f32.xlu0 %v185_v5 }
 0x140   :  { %v161_v11 = vpop.xlane.xlu0 %160  ;;  %v147_v12 = vpop.xlane.xlu1 %146 }
 0x141   :  { %vm162_vm9 = vcmp.eq.f32.partialorder %v159_v2, %v161_v11  ;;  %vm148_vm10 = vcmp.eq.f32.partialorder %v145_v3, %v147_v12  ;;  %v167_v23 = vcvt.f32.s32 %v161_v11  ;;  %v153_v24 = vcvt.f32.s32 %v147_v12 }
 0x142   :  { %v163_v15 = vsel %vm162_vm9, %v158_v13, inf  ;;  %v149_v16 = vsel %vm148_vm10, %v144_v14, inf }
 0x143   :  { %164 = vmin.xlane.f32.xlu1 %v163_v15  ;;  %150 = vmin.xlane.f32.xlu0 %v149_v16  ;;  %v168_v27 = vshll.u32 %v167_v23, 16  ;;  %v154_v28 = vshll.u32 %v153_v24, 16 }
 0x144   :  { %v202_v19 = vpop.xlane.xlu1 %201  ;;  %v187_v20 = vpop.xlane.xlu0 %186 }
 0x145   :  { %vm203_vm11 = vcmp.eq.f32.partialorder %v200_v4, %v202_v19  ;;  %vm188_vm12 = vcmp.eq.f32.partialorder %v185_v5, %v187_v20  ;;  %v208_v31 = vcvt.f32.s32 %v202_v19  ;;  %v193_v32 = vcvt.f32.s32 %v187_v20 }
 0x146   :  { %v204_v21 = vsel %vm203_vm11, %v199_v17, -inf  ;;  %v189_v22 = vsel %vm188_vm12, %v184_v18, -inf }
 0x147   :  { %205 = vmax.xlane.f32.xlu1 %v204_v21  ;;  %190 = vmax.xlane.f32.xlu0 %v189_v22  ;;  %v209_v39 = vshll.u32 %v208_v31, 16  ;;  %v194_v40 = vshll.u32 %v193_v32, 16 }
 0x1d0   :  { %v165_v25 = vpop.xlane.xlu1 %164  ;;  %v151_v26 = vpop.xlane.xlu0 %150 }
 0x1d1   :  { %v166_v29 = vcvt.f32.s32 %v165_v25  ;;  %v152_v30 = vcvt.f32.s32 %v151_v26 }
 0x1d3   :  { %v169_v33 = vadd.s32 %v168_v27, %v166_v29  ;;  %v155_v34 = vadd.s32 %v154_v28, %v152_v30 }
 0x1d4   :  { %v206_v35 = vpop.xlane.xlu1 %205  ;;  %v191_v36 = vpop.xlane.xlu0 %190 }
 0x1d5   :  { %v171_v37 = vand.u32 127, %v169_v33  ;;  %v170_v38 = vand.u32 127, %v155_v34  ;;  %v207_v41 = vcvt.f32.s32 %v206_v35  ;;  %v192_v42 = vcvt.f32.s32 %v191_v36 }
 0x1d6   :  { %v173_v43 = vand.u32 4294967168, %v169_v33  ;;  %v172_v48 = vand.u32 4294967168, %v155_v34 }
 0x1d7   :  { %vm177_vm13 = vcmp.eq.s32.totalorder %v1649_v6, %v171_v37  ;;  %vm176_vm14 = vcmp.eq.s32.totalorder %v1649_v6, %v170_v38  ;;  %v210_v44 = vadd.s32 %v209_v39, %v207_v41  ;;  %v195_v45 = vadd.s32 %v194_v40, %v192_v42 }
 0x1d8   :  { %v1684_v46 = vsel %vm177_vm13, 2147483647, %v1672_v60  ;;  %v1687_v47 = vsel %vm176_vm14, 2147483647, %v1675_v61  ;;  %v224_v58 = vor.u32 %v173_v43, %v1649_v6  ;;  %v223_v60 = vor.u32 %v172_v48, %v1649_v6 }
 0x1d9   :  { %v244_v49 = vshra.s32 %v1684_v46, 16  ;;  %v230_v50 = vshra.s32 %v1687_v47, 16  ;;  %v212_v51 = vand.u32 15, %v210_v44  ;;  %v211_v54 = vand.u32 15, %v195_v45 }
 0x1da   :  { %vm216_vm15 = vcmp.lt.s32.totalorder %v173_v43, %v210_v44  ;;  %vm215_vm2 = vcmp.lt.s32.totalorder %v172_v48, %v195_v45  ;;  %v229_v8 = vand.u32 65535, %v1687_v47 }
 0x1db   :  { %v246_v55 = vcvt.s32.f32 %v244_v49  ;;  %v232_v56 = vcvt.s32.f32 %v230_v50  ;;  %vm214_vm0 = vcmp.eq.s32.totalorder %v1649_v6, %v212_v51  ;;  %vm213_vm1 = vcmp.eq.s32.totalorder %v1649_v6, %v211_v54 }
 0x1dc   :  { %vm222_vm3 = vmand %vm214_vm0, %vm216_vm15 }
 0x1dd   :  { %247 = vmin.xlane.f32.xlu1 %v246_v55  ;;  %233 = vmin.xlane.f32.xlu0 %v232_v56  ;;  %v1696_v61 = vsel %vm222_vm3, %v224_v58, %v1661_v52  ;;  %v1698_v62 = vsel %vm222_vm3, %v171_v37, %v141_v57  ;;  %vm221_vm4 = vmand %vm213_vm1, %vm215_vm2  ;;  %v243_v52 = vand.u32 65535, %v1684_v46 }
 0x1de   :  { %v282_v63 = vsel %vm31_vm6, %v1696_v61, 2147483648  ;;  %v1703_v0 = vsel %vm221_vm4, %v223_v60, %v1663_v53  ;;  %v1705_v1 = vsel %vm221_vm4, %v170_v38, %v140_v59  ;;  %v231_v53 = vcvt.s32.f32 %v229_v8 }
 0x1df   :  { %v284_v2 = vshra.s32 %v282_v63, 16  ;;  %v267_v3 = vsel %vm31_vm6, %v1703_v0, 2147483648  ;;  %v245_v11 = vcvt.s32.f32 %v243_v52  ;;  %v283_v14 = vand.u32 65535, %v282_v63 }
 0x1e0   :  { %v269_v4 = vshra.s32 %v267_v3, 16  ;;  %v268_v15 = vand.u32 65535, %v267_v3 }
 0x1e1   :  { %v286_v5 = vcvt.s32.f32 %v284_v2  ;;  %v285_v17 = vcvt.s32.f32 %v283_v14 }
 0x1e2   :  { %v271_v7 = vcvt.s32.f32 %v269_v4  ;;  %v270_v19 = vcvt.s32.f32 %v268_v15 }
 0x1e3   :  { %287 = vmax.xlane.f32.xlu1 %v286_v5 }
 0x1e4   :  { %272 = vmax.xlane.f32.xlu0 %v271_v7 }
 0x26a   :  { %v248_v9 = vpop.xlane.xlu1 %247  ;;  %v234_v10 = vpop.xlane.xlu0 %233 }
 0x26b   :  { %vm249_vm5 = vcmp.eq.f32.partialorder %v246_v55, %v248_v9  ;;  %vm235_vm7 = vcmp.eq.f32.partialorder %v232_v56, %v234_v10  ;;  %v254_v22 = vcvt.f32.s32 %v248_v9  ;;  %v240_v23 = vcvt.f32.s32 %v234_v10 }
 0x26c   :  { %v250_v12 = vsel %vm249_vm5, %v245_v11, inf  ;;  %v236_v13 = vsel %vm235_vm7, %v231_v53, inf }
 0x26d   :  { %251 = vmin.xlane.f32.xlu1 %v250_v12  ;;  %237 = vmin.xlane.f32.xlu0 %v236_v13  ;;  %v255_v26 = vshll.u32 %v254_v22, 16  ;;  %v241_v27 = vshll.u32 %v240_v23, 16 }
 0x270   :  { %v288_v16 = vpop.xlane.xlu1 %287 }
 0x271   :  { %v273_v18 = vpop.xlane.xlu0 %272  ;;  %vm289_vm8 = vcmp.eq.f32.partialorder %v286_v5, %v288_v16  ;;  %v294_v32 = vcvt.f32.s32 %v288_v16 }
 0x272   :  { %v290_v20 = vsel %vm289_vm8, %v285_v17, -inf  ;;  %vm274_vm9 = vcmp.eq.f32.partialorder %v271_v7, %v273_v18  ;;  %v279_v33 = vcvt.f32.s32 %v273_v18 }
 0x273   :  { %291 = vmax.xlane.f32.xlu1 %v290_v20  ;;  %v275_v21 = vsel %vm274_vm9, %v270_v19, -inf  ;;  %v295_v37 = vshll.u32 %v294_v32, 16 }
 0x274   :  { %276 = vmax.xlane.f32.xlu0 %v275_v21  ;;  %v280_v42 = vshll.u32 %v279_v33, 16 }
 0x2fa   :  { %v252_v24 = vpop.xlane.xlu1 %251  ;;  %v238_v25 = vpop.xlane.xlu0 %237 }
 0x2fb   :  { %v253_v28 = vcvt.f32.s32 %v252_v24  ;;  %v239_v29 = vcvt.f32.s32 %v238_v25 }
 0x2fd   :  { %v256_v30 = vadd.s32 %v255_v26, %v253_v28  ;;  %v242_v31 = vadd.s32 %v241_v27, %v239_v29 }
 0x2ff   :  { %v258_v34 = vand.u32 127, %v256_v30  ;;  %v257_v35 = vand.u32 127, %v242_v31  ;;  %v260_v48 = vand.u32 4294967168, %v256_v30  ;;  %v259_v50 = vand.u32 4294967168, %v242_v31 }
 0x300   :  { %v292_v36 = vpop.xlane.xlu1 %291 }
 0x301   :  { %vm264_vm10 = vcmp.eq.s32.totalorder %v1649_v6, %v258_v34  ;;  %vm263_vm11 = vcmp.eq.s32.totalorder %v1649_v6, %v257_v35  ;;  %v293_v38 = vcvt.f32.s32 %v292_v36  ;;  %v277_v39 = vpop.xlane.xlu0 %276 }
 0x302   :  { %v1714_v40 = vsel %vm264_vm10, 2147483647, %v1684_v46  ;;  %v1717_v41 = vsel %vm263_vm11, 2147483647, %v1687_v47  ;;  %v278_v43 = vcvt.f32.s32 %v277_v39  ;;  %v310_v46 = vor.u32 %v260_v48, %v1649_v6 }
 0x303   :  { %v330_v44 = vshra.s32 %v1714_v40, 16  ;;  %v316_v45 = vshra.s32 %v1717_v41, 16  ;;  %v296_v49 = vadd.s32 %v295_v37, %v293_v38  ;;  %v309_v47 = vor.u32 %v259_v50, %v1649_v6 }
 0x304   :  { %v281_v51 = vadd.s32 %v280_v42, %v278_v43  ;;  %v315_v52 = vand.u32 65535, %v1717_v41 }
 0x305   :  { %v332_v54 = vcvt.s32.f32 %v330_v44  ;;  %v318_v55 = vcvt.s32.f32 %v316_v45  ;;  %v298_v56 = vand.u32 15, %v296_v49  ;;  %vm302_vm12 = vcmp.lt.s32.totalorder %v260_v48, %v296_v49 }
 0x306   :  { %v297_v57 = vand.u32 15, %v281_v51  ;;  %vm301_vm14 = vcmp.lt.s32.totalorder %v259_v50, %v281_v51  ;;  %v317_v10 = vcvt.s32.f32 %v315_v52 }
 0x307   :  { %333 = vmin.xlane.f32.xlu1 %v332_v54  ;;  %319 = vmin.xlane.f32.xlu0 %v318_v55  ;;  %vm300_vm13 = vcmp.eq.s32.totalorder %v1649_v6, %v298_v56 }
 0x308   :  { %vm308_vm15 = vmand %vm300_vm13, %vm302_vm12  ;;  %vm299_vm0 = vcmp.eq.s32.totalorder %v1649_v6, %v297_v57 }
 0x309   :  { %v1726_v58 = vsel %vm308_vm15, %v310_v46, %v1696_v61  ;;  %v1729_v59 = vsel %vm308_vm15, %v258_v34, %v1698_v62  ;;  %vm307_vm1 = vmand %vm299_vm0, %vm301_vm14  ;;  %v329_v62 = vand.u32 65535, %v1714_v40 }
 0x30a   :  { %v368_v60 = vsel %vm31_vm6, %v1726_v58, 2147483648  ;;  %v1734_v63 = vsel %vm307_vm1, %v309_v47, %v1703_v0  ;;  %v1737_v2 = vsel %vm307_vm1, %v257_v35, %v1705_v1 }
 0x30b   :  { %v370_v3 = vshra.s32 %v368_v60, 16  ;;  %v353_v4 = vsel %vm31_vm6, %v1734_v63, 2147483648  ;;  %v331_v0 = vcvt.s32.f32 %v329_v62  ;;  %v369_v53 = vand.u32 65535, %v368_v60 }
 0x30c   :  { %v355_v5 = vshra.s32 %v353_v4, 16  ;;  %v354_v12 = vand.u32 65535, %v353_v4 }
 0x30d   :  { %v372_v61 = vcvt.s32.f32 %v370_v3  ;;  %v371_v14 = vcvt.s32.f32 %v369_v53 }
 0x30e   :  { %v357_v7 = vcvt.s32.f32 %v355_v5  ;;  %v356_v16 = vcvt.s32.f32 %v354_v12 }
 0x30f   :  { %373 = vmax.xlane.f32.xlu1 %v372_v61 }
 0x310   :  { %358 = vmax.xlane.f32.xlu0 %v357_v7 }
 0x394   :  { %v334_v8 = vpop.xlane.xlu1 %333  ;;  %v320_v9 = vpop.xlane.xlu0 %319 }
 0x395   :  { %vm335_vm2 = vcmp.eq.f32.partialorder %v332_v54, %v334_v8  ;;  %vm321_vm3 = vcmp.eq.f32.partialorder %v318_v55, %v320_v9  ;;  %v340_v19 = vcvt.f32.s32 %v334_v8  ;;  %v326_v20 = vcvt.f32.s32 %v320_v9 }
 0x396   :  { %v336_v1 = vsel %vm335_vm2, %v331_v0, inf  ;;  %v322_v11 = vsel %vm321_vm3, %v317_v10, inf }
 0x397   :  { %337 = vmin.xlane.f32.xlu1 %v336_v1  ;;  %323 = vmin.xlane.f32.xlu0 %v322_v11  ;;  %v341_v23 = vshll.u32 %v340_v19, 16  ;;  %v327_v24 = vshll.u32 %v326_v20, 16 }
 0x39c   :  { %v374_v13 = vpop.xlane.xlu1 %373 }
 0x39d   :  { %v359_v15 = vpop.xlane.xlu0 %358  ;;  %vm375_vm4 = vcmp.eq.f32.partialorder %v372_v61, %v374_v13  ;;  %v380_v31 = vcvt.f32.s32 %v374_v13 }
 0x39e   :  { %v376_v17 = vsel %vm375_vm4, %v371_v14, -inf  ;;  %vm360_vm5 = vcmp.eq.f32.partialorder %v357_v7, %v359_v15  ;;  %v365_v32 = vcvt.f32.s32 %v359_v15 }
 0x39f   :  { %377 = vmax.xlane.f32.xlu1 %v376_v17  ;;  %v361_v18 = vsel %vm360_vm5, %v356_v16, -inf  ;;  %v381_v38 = vshll.u32 %v380_v31, 16 }
 0x3a0   :  { %362 = vmax.xlane.f32.xlu0 %v361_v18  ;;  %v366_v43 = vshll.u32 %v365_v32, 16 }
 0x424   :  { %v338_v21 = vpop.xlane.xlu1 %337  ;;  %v324_v22 = vpop.xlane.xlu0 %323 }
 0x425   :  { %v339_v25 = vcvt.f32.s32 %v338_v21  ;;  %v325_v26 = vcvt.f32.s32 %v324_v22 }
 0x427   :  { %v342_v27 = vadd.s32 %v341_v23, %v339_v25  ;;  %v328_v28 = vadd.s32 %v327_v24, %v325_v26 }
 0x429   :  { %v344_v29 = vand.u32 127, %v342_v27  ;;  %v343_v30 = vand.u32 127, %v328_v28  ;;  %v346_v49 = vand.u32 4294967168, %v342_v27  ;;  %v345_v51 = vand.u32 4294967168, %v328_v28 }
 0x42b   :  { %vm350_vm7 = vcmp.eq.s32.totalorder %v1649_v6, %v344_v29  ;;  %vm349_vm8 = vcmp.eq.s32.totalorder %v1649_v6, %v343_v30  ;;  %v396_v55 = vor.u32 %v346_v49, %v1649_v6  ;;  %v395_v56 = vor.u32 %v345_v51, %v1649_v6 }
 0x42c   :  { %v1746_v33 = vsel %vm350_vm7, 2147483647, %v1714_v40  ;;  %v1749_v34 = vsel %vm349_vm8, 2147483647, %v1717_v41  ;;  %v378_v35 = vpop.xlane.xlu1 %377 }
 0x42d   :  { %v416_v36 = vshra.s32 %v1746_v33, 16  ;;  %v402_v37 = vshra.s32 %v1749_v34, 16  ;;  %v379_v39 = vcvt.f32.s32 %v378_v35  ;;  %v363_v42 = vpop.xlane.xlu0 %362  ;;  %v401_v62 = vand.u32 65535, %v1749_v34 }
 0x42e   :  { %v364_v44 = vcvt.f32.s32 %v363_v42 }
 0x42f   :  { %v418_v45 = vcvt.s32.f32 %v416_v36  ;;  %v404_v48 = vcvt.s32.f32 %v402_v37  ;;  %v382_v50 = vadd.s32 %v381_v38, %v379_v39  ;;  %v403_v9 = vcvt.s32.f32 %v401_v62 }
 0x430   :  { %v367_v40 = vadd.s32 %v366_v43, %v364_v44 }
 0x431   :  { %419 = vmin.xlane.f32.xlu1 %v418_v45  ;;  %405 = vmin.xlane.f32.xlu0 %v404_v48  ;;  %v384_v41 = vand.u32 15, %v382_v50  ;;  %vm388_vm9 = vcmp.lt.s32.totalorder %v346_v49, %v382_v50 }
 0x432   :  { %v383_v54 = vand.u32 15, %v367_v40  ;;  %vm387_vm11 = vcmp.lt.s32.totalorder %v345_v51, %v367_v40 }
 0x433   :  { %vm386_vm10 = vcmp.eq.s32.totalorder %v1649_v6, %v384_v41 }
 0x434   :  { %vm394_vm12 = vmand %vm386_vm10, %vm388_vm9  ;;  %vm385_vm13 = vcmp.eq.s32.totalorder %v1649_v6, %v383_v54 }
 0x435   :  { %v1758_v57 = vsel %vm394_vm12, %v396_v55, %v1726_v58  ;;  %v1761_v46 = vsel %vm394_vm12, %v344_v29, %v1729_v59  ;;  %vm393_vm14 = vmand %vm385_vm13, %vm387_vm11  ;;  %v415_v59 = vand.u32 65535, %v1746_v33 }
 0x436   :  { %v454_v47 = vsel %vm31_vm6, %v1758_v57, 2147483648  ;;  %v1766_v60 = vsel %vm393_vm14, %v395_v56, %v1734_v63  ;;  %v1769_v3 = vsel %vm393_vm14, %v343_v30, %v1737_v2 }
 0x437   :  { %v456_v4 = vshra.s32 %v454_v47, 16  ;;  %v439_v5 = vsel %vm31_vm6, %v1766_v60, 2147483648  ;;  %v417_v63 = vcvt.s32.f32 %v415_v59  ;;  %v455_v10 = vand.u32 65535, %v454_v47 }
 0x438   :  { %v441_v61 = vshra.s32 %v439_v5, 16  ;;  %v440_v1 = vand.u32 65535, %v439_v5 }
 0x439   :  { %v458_v58 = vcvt.s32.f32 %v456_v4  ;;  %v457_v53 = vcvt.s32.f32 %v455_v10 }
 0x43a   :  { %v443_v7 = vcvt.s32.f32 %v441_v61  ;;  %v442_v13 = vcvt.s32.f32 %v440_v1 }
 0x43b   :  { %459 = vmax.xlane.f32.xlu1 %v458_v58 }
 0x43c   :  { %444 = vmax.xlane.f32.xlu0 %v443_v7 }
 0x4be   :  { %v420_v52 = vpop.xlane.xlu1 %419  ;;  %v406_v8 = vpop.xlane.xlu0 %405 }
 0x4bf   :  { %vm421_vm15 = vcmp.eq.f32.partialorder %v418_v45, %v420_v52  ;;  %vm407_vm0 = vcmp.eq.f32.partialorder %v404_v48, %v406_v8  ;;  %v426_v16 = vcvt.f32.s32 %v420_v52  ;;  %v412_v17 = vcvt.f32.s32 %v406_v8 }
 0x4c0   :  { %v422_v2 = vsel %vm421_vm15, %v417_v63, inf  ;;  %v408_v0 = vsel %vm407_vm0, %v403_v9, inf }
 0x4c1   :  { %423 = vmin.xlane.f32.xlu1 %v422_v2  ;;  %409 = vmin.xlane.f32.xlu0 %v408_v0  ;;  %v427_v20 = vshll.u32 %v426_v16, 16  ;;  %v413_v21 = vshll.u32 %v412_v17, 16 }
 0x4c8   :  { %v460_v11 = vpop.xlane.xlu1 %459 }
 0x4c9   :  { %v445_v12 = vpop.xlane.xlu0 %444  ;;  %vm461_vm1 = vcmp.eq.f32.partialorder %v458_v58, %v460_v11  ;;  %v466_v28 = vcvt.f32.s32 %v460_v11 }
 0x4ca   :  { %v462_v14 = vsel %vm461_vm1, %v457_v53, -inf  ;;  %vm446_vm2 = vcmp.eq.f32.partialorder %v443_v7, %v445_v12  ;;  %v451_v31 = vcvt.f32.s32 %v445_v12 }
 0x4cb   :  { %463 = vmax.xlane.f32.xlu1 %v462_v14  ;;  %v447_v15 = vsel %vm446_vm2, %v442_v13, -inf  ;;  %v467_v39 = vshll.u32 %v466_v28, 16 }
 0x4cc   :  { %448 = vmax.xlane.f32.xlu0 %v447_v15  ;;  %v452_v44 = vshll.u32 %v451_v31, 16 }
 0x54e   :  { %v424_v18 = vpop.xlane.xlu1 %423  ;;  %v410_v19 = vpop.xlane.xlu0 %409 }
 0x54f   :  { %v425_v22 = vcvt.f32.s32 %v424_v18  ;;  %v411_v23 = vcvt.f32.s32 %v410_v19 }
 0x551   :  { %v428_v24 = vadd.s32 %v427_v20, %v425_v22  ;;  %v414_v25 = vadd.s32 %v413_v21, %v411_v23 }
 0x553   :  { %v430_v26 = vand.u32 127, %v428_v24  ;;  %v429_v27 = vand.u32 127, %v414_v25  ;;  %v431_v49 = vand.u32 4294967168, %v414_v25 }
 0x555   :  { %vm436_vm3 = vcmp.eq.s32.totalorder %v1649_v6, %v430_v26  ;;  %vm435_vm4 = vcmp.eq.s32.totalorder %v1649_v6, %v429_v27  ;;  %v481_v41 = vor.u32 %v431_v49, %v1649_v6 }
 0x556   :  { %v1778_v29 = vsel %vm436_vm3, 2147483647, %v1746_v33  ;;  %v1781_v30 = vsel %vm435_vm4, 2147483647, %v1749_v34  ;;  %v432_v33 = vand.u32 4294967168, %v428_v24 }
 0x557   :  { %v502_v32 = vshra.s32 %v1778_v29, 16  ;;  %v488_v35 = vshra.s32 %v1781_v30, 16 }
 0x558   :  { %v464_v36 = vpop.xlane.xlu1 %463  ;;  %v482_v40 = vor.u32 %v432_v33, %v1649_v6 }
 0x559   :  { %v504_v37 = vcvt.s32.f32 %v502_v32  ;;  %v490_v38 = vcvt.s32.f32 %v488_v35  ;;  %v465_v42 = vcvt.f32.s32 %v464_v36  ;;  %v449_v43 = vpop.xlane.xlu0 %448 }
 0x55a   :  { %v450_v45 = vcvt.f32.s32 %v449_v43 }
 0x55b   :  { %505 = vmin.xlane.f32.xlu1 %v504_v37  ;;  %491 = vmin.xlane.f32.xlu0 %v490_v38  ;;  %v468_v48 = vadd.s32 %v467_v39, %v465_v42 }
 0x55c   :  { %v453_v34 = vadd.s32 %v452_v44, %v450_v45 }
 0x55d   :  { %v470_v50 = vand.u32 15, %v468_v48  ;;  %vm474_vm7 = vcmp.lt.s32.totalorder %v432_v33, %v468_v48 }
 0x55e   :  { %v469_v51 = vand.u32 15, %v453_v34  ;;  %vm473_vm10 = vcmp.lt.s32.totalorder %v431_v49, %v453_v34 }
 0x55f   :  { %vm472_vm5 = vcmp.eq.s32.totalorder %v1649_v6, %v470_v50 }
 0x560   :  { %vm480_vm8 = vmand %vm472_vm5, %vm474_vm7  ;;  %vm471_vm9 = vcmp.eq.s32.totalorder %v1649_v6, %v469_v51 }
 0x561   :  { %v1790_v54 = vsel %vm480_vm8, %v430_v26, %v1761_v46  ;;  %vm479_vm11 = vmand %vm471_vm9, %vm473_vm10  ;;  %v1793_v55 = vsel %vm480_vm8, %v482_v40, %v1758_v57  ;;  %v501_v57 = vand.u32 65535, %v1778_v29 }
 0x562   :  { %v1796_v56 = vsel %vm479_vm11, %v429_v27, %v1769_v3  ;;  %v540_v47 = vsel %vm31_vm6, %v1793_v55, 2147483648  ;;  %v1801_v4 = vsel %vm479_vm11, %v481_v41, %v1766_v60  ;;  %v487_v3 = vand.u32 65535, %v1781_v30 }
 0x563   :  { %v542_v5 = vshra.s32 %v540_v47, 16  ;;  %v525_v61 = vsel %vm31_vm6, %v1801_v4, 2147483648  ;;  %v503_v52 = vcvt.s32.f32 %v501_v57  ;;  %v541_v9 = vand.u32 65535, %v540_v47 }
 0x564   :  { %v527_v58 = vshra.s32 %v525_v61, 16  ;;  %v489_v8 = vcvt.s32.f32 %v487_v3  ;;  %v526_v2 = vand.u32 65535, %v525_v61 }
 0x565   :  { %v544_v46 = vcvt.s32.f32 %v542_v5  ;;  %v543_v10 = vcvt.s32.f32 %v541_v9 }
 0x566   :  { %v529_v7 = vcvt.s32.f32 %v527_v58  ;;  %v528_v11 = vcvt.s32.f32 %v526_v2 }
 0x567   :  { %545 = vmax.xlane.f32.xlu1 %v544_v46 }
 0x568   :  { %530 = vmax.xlane.f32.xlu0 %v529_v7 }
 0x5e8   :  { %v506_v59 = vpop.xlane.xlu1 %505  ;;  %v492_v62 = vpop.xlane.xlu0 %491 }
 0x5e9   :  { %vm507_vm12 = vcmp.eq.f32.partialorder %v504_v37, %v506_v59  ;;  %vm493_vm13 = vcmp.eq.f32.partialorder %v490_v38, %v492_v62  ;;  %v512_v13 = vcvt.f32.s32 %v506_v59  ;;  %v498_v14 = vcvt.f32.s32 %v492_v62 }
 0x5ea   :  { %v508_v60 = vsel %vm507_vm12, %v503_v52, inf  ;;  %v494_v63 = vsel %vm493_vm13, %v489_v8, inf }
 0x5eb   :  { %509 = vmin.xlane.f32.xlu1 %v508_v60  ;;  %495 = vmin.xlane.f32.xlu0 %v494_v63  ;;  %v513_v17 = vshll.u32 %v512_v13, 16  ;;  %v499_v18 = vshll.u32 %v498_v14, 16 }
 0x5f4   :  { %v546_v0 = vpop.xlane.xlu1 %545 }
 0x5f5   :  { %v531_v1 = vpop.xlane.xlu0 %530  ;;  %vm547_vm14 = vcmp.eq.f32.partialorder %v544_v46, %v546_v0  ;;  %v552_v31 = vcvt.f32.s32 %v546_v0 }
 0x5f6   :  { %v548_v53 = vsel %vm547_vm14, %v543_v10, -inf  ;;  %vm532_vm15 = vcmp.eq.f32.partialorder %v529_v7, %v531_v1  ;;  %v537_v32 = vcvt.f32.s32 %v531_v1 }
 0x5f7   :  { %549 = vmax.xlane.f32.xlu1 %v548_v53  ;;  %v533_v12 = vsel %vm532_vm15, %v528_v11, -inf  ;;  %v553_v38 = vshll.u32 %v552_v31, 16 }
 0x5f8   :  { %534 = vmax.xlane.f32.xlu0 %v533_v12  ;;  %v538_v43 = vshll.u32 %v537_v32, 16 }
 0x678   :  { %v510_v15 = vpop.xlane.xlu1 %509  ;;  %v496_v16 = vpop.xlane.xlu0 %495 }
 0x679   :  { %v511_v19 = vcvt.f32.s32 %v510_v15  ;;  %v497_v20 = vcvt.f32.s32 %v496_v16 }
 0x67b   :  { %v514_v21 = vadd.s32 %v513_v17, %v511_v19  ;;  %v500_v22 = vadd.s32 %v499_v18, %v497_v20 }
 0x67d   :  { %v516_v23 = vand.u32 127, %v514_v21  ;;  %v515_v24 = vand.u32 127, %v500_v22  ;;  %v518_v44 = vand.u32 4294967168, %v514_v21 }
 0x67f   :  { %vm522_vm0 = vcmp.eq.s32.totalorder %v1649_v6, %v516_v23  ;;  %vm521_vm1 = vcmp.eq.s32.totalorder %v1649_v6, %v515_v24  ;;  %v568_v34 = vor.u32 %v518_v44, %v1649_v6 }
 0x680   :  { %v1810_v25 = vsel %vm522_vm0, 2147483647, %v1778_v29  ;;  %v1813_v26 = vsel %vm521_vm1, 2147483647, %v1781_v30  ;;  %v517_v30 = vand.u32 4294967168, %v500_v22 }
 0x681   :  { %v588_v27 = vshra.s32 %v1810_v25, 16  ;;  %v574_v28 = vshra.s32 %v1813_v26, 16 }
 0x682   :  { %v567_v50 = vor.u32 %v517_v30, %v1649_v6 }
 0x683   :  { %v590_v35 = vcvt.s32.f32 %v588_v27  ;;  %v576_v36 = vcvt.s32.f32 %v574_v28 }
 0x684   :  { %v550_v37 = vpop.xlane.xlu1 %549 }
 0x685   :  { %591 = vmin.xlane.f32.xlu1 %v590_v35  ;;  %577 = vmin.xlane.f32.xlu0 %v576_v36  ;;  %v551_v39 = vcvt.f32.s32 %v550_v37  ;;  %v535_v42 = vpop.xlane.xlu0 %534 }
 0x686   :  { %v536_v29 = vcvt.f32.s32 %v535_v42 }
 0x687   :  { %v554_v45 = vadd.s32 %v553_v38, %v551_v39 }
 0x688   :  { %v539_v33 = vadd.s32 %v538_v43, %v536_v29 }
 0x689   :  { %v556_v48 = vand.u32 15, %v554_v45  ;;  %vm560_vm3 = vcmp.lt.s32.totalorder %v518_v44, %v554_v45 }
 0x68a   :  { %v555_v49 = vand.u32 15, %v539_v33  ;;  %vm559_vm7 = vcmp.lt.s32.totalorder %v517_v30, %v539_v33 }
 0x68b   :  { %vm558_vm2 = vcmp.eq.s32.totalorder %v1649_v6, %v556_v48 }
 0x68c   :  { %vm566_vm4 = vmand %vm558_vm2, %vm560_vm3  ;;  %vm557_vm5 = vcmp.eq.s32.totalorder %v1649_v6, %v555_v49 }
 0x68d   :  { %v1822_v51 = vsel %vm566_vm4, %v516_v23, %v1790_v54  ;;  %vm565_vm8 = vmand %vm557_vm5, %vm559_vm7  ;;  %v1825_v40 = vsel %vm566_vm4, %v568_v34, %v1793_v55  ;;  %v587_v55 = vand.u32 65535, %v1810_v25 }
 0x68e   :  { %v1828_v41 = vsel %vm565_vm8, %v515_v24, %v1796_v56  ;;  %v626_v47 = vsel %vm31_vm6, %v1825_v40, 2147483648  ;;  %v1833_v5 = vsel %vm565_vm8, %v567_v50, %v1801_v4  ;;  %v573_v56 = vand.u32 65535, %v1813_v26 }
 0x68f   :  { %v628_v61 = vshra.s32 %v626_v47, 16  ;;  %v611_v58 = vsel %vm31_vm6, %v1833_v5, 2147483648  ;;  %v589_v59 = vcvt.s32.f32 %v587_v55  ;;  %v627_v8 = vand.u32 65535, %v626_v47 }
 0x690   :  { %v613_v46 = vshra.s32 %v611_v58, 16  ;;  %v575_v62 = vcvt.s32.f32 %v573_v56  ;;  %v612_v60 = vand.u32 65535, %v611_v58 }
 0x691   :  { %v630_v54 = vcvt.s32.f32 %v628_v61  ;;  %v629_v9 = vcvt.s32.f32 %v627_v8 }
 0x692   :  { %v615_v7 = vcvt.s32.f32 %v613_v46  ;;  %v614_v0 = vcvt.s32.f32 %v612_v60 }
 0x693   :  { %631 = vmax.xlane.f32.xlu1 %v630_v54 }
 0x694   :  { %616 = vmax.xlane.f32.xlu0 %v615_v7 }
 0x712   :  { %v592_v57 = vpop.xlane.xlu1 %591  ;;  %v578_v3 = vpop.xlane.xlu0 %577 }
 0x713   :  { %vm593_vm9 = vcmp.eq.f32.partialorder %v590_v35, %v592_v57  ;;  %vm579_vm10 = vcmp.eq.f32.partialorder %v576_v36, %v578_v3  ;;  %v598_v11 = vcvt.f32.s32 %v592_v57  ;;  %v584_v53 = vcvt.f32.s32 %v578_v3 }
 0x714   :  { %v594_v4 = vsel %vm593_vm9, %v589_v59, inf  ;;  %v580_v52 = vsel %vm579_vm10, %v575_v62, inf }
 0x715   :  { %595 = vmin.xlane.f32.xlu1 %v594_v4  ;;  %581 = vmin.xlane.f32.xlu0 %v580_v52  ;;  %v599_v14 = vshll.u32 %v598_v11, 16  ;;  %v585_v15 = vshll.u32 %v584_v53, 16 }
 0x720   :  { %v632_v63 = vpop.xlane.xlu1 %631 }
 0x721   :  { %v617_v2 = vpop.xlane.xlu0 %616  ;;  %vm633_vm11 = vcmp.eq.f32.partialorder %v630_v54, %v632_v63  ;;  %v638_v32 = vcvt.f32.s32 %v632_v63 }
 0x722   :  { %v634_v10 = vsel %vm633_vm11, %v629_v9, -inf  ;;  %vm618_vm12 = vcmp.eq.f32.partialorder %v615_v7, %v617_v2  ;;  %v623_v35 = vcvt.f32.s32 %v617_v2 }
 0x723   :  { %635 = vmax.xlane.f32.xlu1 %v634_v10  ;;  %v619_v1 = vsel %vm618_vm12, %v614_v0, -inf  ;;  %v639_v37 = vshll.u32 %v638_v32, 16 }
 0x724   :  { %620 = vmax.xlane.f32.xlu0 %v619_v1  ;;  %v624_v42 = vshll.u32 %v623_v35, 16 }
 0x7a2   :  { %v596_v12 = vpop.xlane.xlu1 %595  ;;  %v582_v13 = vpop.xlane.xlu0 %581 }
 0x7a3   :  { %v597_v16 = vcvt.f32.s32 %v596_v12  ;;  %v583_v17 = vcvt.f32.s32 %v582_v13 }
 0x7a5   :  { %v600_v18 = vadd.s32 %v599_v14, %v597_v16  ;;  %v586_v19 = vadd.s32 %v585_v15, %v583_v17 }
 0x7a7   :  { %v602_v20 = vand.u32 127, %v600_v18  ;;  %v601_v21 = vand.u32 127, %v586_v19  ;;  %v604_v43 = vand.u32 4294967168, %v600_v18 }
 0x7a9   :  { %vm608_vm13 = vcmp.eq.s32.totalorder %v1649_v6, %v602_v20  ;;  %vm607_vm14 = vcmp.eq.s32.totalorder %v1649_v6, %v601_v21  ;;  %v654_v33 = vor.u32 %v604_v43, %v1649_v6 }
 0x7aa   :  { %v1842_v22 = vsel %vm608_vm13, 2147483647, %v1810_v25  ;;  %v1845_v23 = vsel %vm607_vm14, 2147483647, %v1813_v26  ;;  %v603_v26 = vand.u32 4294967168, %v586_v19 }
 0x7ab   :  { %v674_v24 = vshra.s32 %v1842_v22, 16  ;;  %v660_v27 = vshra.s32 %v1845_v23, 16 }
 0x7ac   :  { %v653_v48 = vor.u32 %v603_v26, %v1649_v6 }
 0x7ad   :  { %v676_v28 = vcvt.s32.f32 %v674_v24  ;;  %v662_v31 = vcvt.s32.f32 %v660_v27 }
 0x7af   :  { %677 = vmin.xlane.f32.xlu1 %v676_v28  ;;  %663 = vmin.xlane.f32.xlu0 %v662_v31 }
 0x7b0   :  { %v636_v36 = vpop.xlane.xlu1 %635 }
 0x7b1   :  { %v637_v38 = vcvt.f32.s32 %v636_v36  ;;  %v621_v39 = vpop.xlane.xlu0 %620 }
 0x7b2   :  { %v622_v25 = vcvt.f32.s32 %v621_v39 }
 0x7b3   :  { %v640_v29 = vadd.s32 %v639_v37, %v637_v38 }
 0x7b4   :  { %v625_v44 = vadd.s32 %v624_v42, %v622_v25 }
 0x7b5   :  { %v642_v45 = vand.u32 15, %v640_v29  ;;  %vm646_vm0 = vcmp.lt.s32.totalorder %v604_v43, %v640_v29 }
 0x7b6   :  { %v641_v30 = vand.u32 15, %v625_v44  ;;  %vm645_vm3 = vcmp.lt.s32.totalorder %v603_v26, %v625_v44 }
 0x7b7   :  { %vm644_vm15 = vcmp.eq.s32.totalorder %v1649_v6, %v642_v45 }
 0x7b8   :  { %vm652_vm1 = vmand %vm644_vm15, %vm646_vm0  ;;  %vm643_vm2 = vcmp.eq.s32.totalorder %v1649_v6, %v641_v30 }
 0x7b9   :  { %v1854_v49 = vsel %vm652_vm1, %v602_v20, %v1822_v51  ;;  %vm651_vm4 = vmand %vm643_vm2, %vm645_vm3  ;;  %v1857_v34 = vsel %vm652_vm1, %v654_v33, %v1825_v40  ;;  %v673_v40 = vand.u32 65535, %v1842_v22 }
 0x7ba   :  { %v1860_v50 = vsel %vm651_vm4, %v601_v21, %v1828_v41  ;;  %v712_v47 = vsel %vm31_vm6, %v1857_v34, 2147483648  ;;  %v1865_v61 = vsel %vm651_vm4, %v653_v48, %v1833_v5  ;;  %v659_v41 = vand.u32 65535, %v1845_v23 }
 0x7bb   :  { %v714_v58 = vshra.s32 %v712_v47, 16  ;;  %v697_v46 = vsel %vm31_vm6, %v1865_v61, 2147483648  ;;  %v675_v57 = vcvt.s32.f32 %v673_v40  ;;  %v713_v62 = vand.u32 65535, %v712_v47 }
 0x7bc   :  { %v699_v54 = vshra.s32 %v697_v46, 16  ;;  %v661_v3 = vcvt.s32.f32 %v659_v41  ;;  %v698_v4 = vand.u32 65535, %v697_v46 }
 0x7bd   :  { %v716_v51 = vcvt.s32.f32 %v714_v58  ;;  %v715_v8 = vcvt.s32.f32 %v713_v62 }
 0x7be   :  { %v701_v7 = vcvt.s32.f32 %v699_v54  ;;  %v700_v63 = vcvt.s32.f32 %v698_v4 }
 0x7bf   :  { %717 = vmax.xlane.f32.xlu1 %v716_v51 }
 0x7c0   :  { %702 = vmax.xlane.f32.xlu0 %v701_v7 }
 0x83c   :  { %v678_v55 = vpop.xlane.xlu1 %677  ;;  %v664_v56 = vpop.xlane.xlu0 %663 }
 0x83d   :  { %vm679_vm5 = vcmp.eq.f32.partialorder %v676_v28, %v678_v55  ;;  %vm665_vm7 = vcmp.eq.f32.partialorder %v662_v31, %v664_v56  ;;  %v684_v0 = vcvt.f32.s32 %v678_v55  ;;  %v670_v10 = vcvt.f32.s32 %v664_v56 }
 0x83e   :  { %v680_v5 = vsel %vm679_vm5, %v675_v57, inf  ;;  %v666_v59 = vsel %vm665_vm7, %v661_v3, inf }
 0x83f   :  { %681 = vmin.xlane.f32.xlu1 %v680_v5  ;;  %667 = vmin.xlane.f32.xlu0 %v666_v59  ;;  %v685_v53 = vshll.u32 %v684_v0, 16  ;;  %v671_v12 = vshll.u32 %v670_v10, 16 }
 0x84c   :  { %v718_v52 = vpop.xlane.xlu1 %717 }
 0x84d   :  { %v703_v60 = vpop.xlane.xlu0 %702  ;;  %vm719_vm8 = vcmp.eq.f32.partialorder %v716_v51, %v718_v52  ;;  %v724_v31 = vcvt.f32.s32 %v718_v52 }
 0x84e   :  { %v720_v9 = vsel %vm719_vm8, %v715_v8, -inf  ;;  %vm704_vm9 = vcmp.eq.f32.partialorder %v701_v7, %v703_v60  ;;  %v709_v32 = vcvt.f32.s32 %v703_v60 }
 0x84f   :  { %721 = vmax.xlane.f32.xlu1 %v720_v9  ;;  %v705_v2 = vsel %vm704_vm9, %v700_v63, -inf  ;;  %v725_v36 = vshll.u32 %v724_v31, 16 }
 0x850   :  { %706 = vmax.xlane.f32.xlu0 %v705_v2  ;;  %v710_v39 = vshll.u32 %v709_v32, 16 }
 0x8cc   :  { %v682_v1 = vpop.xlane.xlu1 %681  ;;  %v668_v11 = vpop.xlane.xlu0 %667 }
 0x8cd   :  { %v683_v13 = vcvt.f32.s32 %v682_v1  ;;  %v669_v14 = vcvt.f32.s32 %v668_v11 }
 0x8cf   :  { %v686_v15 = vadd.s32 %v685_v53, %v683_v13  ;;  %v672_v16 = vadd.s32 %v671_v12, %v669_v14 }
 0x8d1   :  { %v688_v17 = vand.u32 127, %v686_v15  ;;  %v687_v18 = vand.u32 127, %v672_v16  ;;  %v690_v42 = vand.u32 4294967168, %v686_v15 }
 0x8d3   :  { %vm694_vm10 = vcmp.eq.s32.totalorder %v1649_v6, %v688_v17  ;;  %vm693_vm11 = vcmp.eq.s32.totalorder %v1649_v6, %v687_v18  ;;  %v740_v44 = vor.u32 %v690_v42, %v1649_v6 }
 0x8d4   :  { %v1874_v19 = vsel %vm694_vm10, 2147483647, %v1842_v22  ;;  %v1877_v20 = vsel %vm693_vm11, 2147483647, %v1845_v23  ;;  %v689_v23 = vand.u32 4294967168, %v672_v16 }
 0x8d5   :  { %v760_v21 = vshra.s32 %v1874_v19, 16  ;;  %v746_v24 = vshra.s32 %v1877_v20, 16 }
 0x8d6   :  { %v739_v45 = vor.u32 %v689_v23, %v1649_v6 }
 0x8d7   :  { %v762_v27 = vcvt.s32.f32 %v760_v21  ;;  %v748_v28 = vcvt.s32.f32 %v746_v24 }
 0x8d9   :  { %763 = vmin.xlane.f32.xlu1 %v762_v27  ;;  %749 = vmin.xlane.f32.xlu0 %v748_v28 }
 0x8dc   :  { %v722_v35 = vpop.xlane.xlu1 %721 }
 0x8dd   :  { %v723_v37 = vcvt.f32.s32 %v722_v35  ;;  %v707_v38 = vpop.xlane.xlu0 %706 }
 0x8de   :  { %v708_v22 = vcvt.f32.s32 %v707_v38 }
 0x8df   :  { %v726_v25 = vadd.s32 %v725_v36, %v723_v37 }
 0x8e0   :  { %v711_v43 = vadd.s32 %v710_v39, %v708_v22 }
 0x8e1   :  { %v728_v29 = vand.u32 15, %v726_v25  ;;  %vm732_vm13 = vcmp.lt.s32.totalorder %v690_v42, %v726_v25 }
 0x8e2   :  { %v727_v26 = vand.u32 15, %v711_v43  ;;  %vm731_vm0 = vcmp.lt.s32.totalorder %v689_v23, %v711_v43 }
 0x8e3   :  { %vm730_vm12 = vcmp.eq.s32.totalorder %v1649_v6, %v728_v29 }
 0x8e4   :  { %vm738_vm14 = vmand %vm730_vm12, %vm732_vm13  ;;  %vm729_vm15 = vcmp.eq.s32.totalorder %v1649_v6, %v727_v26 }
 0x8e5   :  { %v1886_v30 = vsel %vm738_vm14, %v688_v17, %v1854_v49  ;;  %vm737_vm1 = vmand %vm729_vm15, %vm731_vm0  ;;  %v1889_v33 = vsel %vm738_vm14, %v740_v44, %v1857_v34  ;;  %v759_v34 = vand.u32 65535, %v1874_v19 }
 0x8e6   :  { %v1892_v48 = vsel %vm737_vm1, %v687_v18, %v1860_v50  ;;  %v798_v47 = vsel %vm31_vm6, %v1889_v33, 2147483648  ;;  %v1897_v58 = vsel %vm737_vm1, %v739_v45, %v1865_v61  ;;  %v745_v50 = vand.u32 65535, %v1877_v20 }
 0x8e7   :  { %v800_v46 = vshra.s32 %v798_v47, 16  ;;  %v783_v54 = vsel %vm31_vm6, %v1897_v58, 2147483648  ;;  %v761_v55 = vcvt.s32.f32 %v759_v34  ;;  %v799_v3 = vand.u32 65535, %v798_v47 }
 0x8e8   :  { %v785_v51 = vshra.s32 %v783_v54, 16  ;;  %v747_v56 = vcvt.s32.f32 %v745_v50  ;;  %v784_v5 = vand.u32 65535, %v783_v54 }
 0x8e9   :  { %v802_v49 = vcvt.s32.f32 %v800_v46  ;;  %v801_v62 = vcvt.s32.f32 %v799_v3 }
 0x8ea   :  { %v787_v7 = vcvt.s32.f32 %v785_v51  ;;  %v786_v52 = vcvt.s32.f32 %v784_v5 }
 0x8eb   :  { %803 = vmax.xlane.f32.xlu1 %v802_v49 }
 0x8ec   :  { %788 = vmax.xlane.f32.xlu0 %v787_v7 }
 0x966   :  { %v764_v40 = vpop.xlane.xlu1 %763  ;;  %v750_v41 = vpop.xlane.xlu0 %749 }
 0x967   :  { %vm765_vm2 = vcmp.eq.f32.partialorder %v762_v27, %v764_v40  ;;  %vm751_vm3 = vcmp.eq.f32.partialorder %v748_v28, %v750_v41  ;;  %v770_v63 = vcvt.f32.s32 %v764_v40  ;;  %v756_v9 = vcvt.f32.s32 %v750_v41 }
 0x968   :  { %v766_v61 = vsel %vm765_vm2, %v761_v55, inf  ;;  %v752_v57 = vsel %vm751_vm3, %v747_v56, inf }
 0x969   :  { %767 = vmin.xlane.f32.xlu1 %v766_v61  ;;  %753 = vmin.xlane.f32.xlu0 %v752_v57  ;;  %v771_v10 = vshll.u32 %v770_v63, 16  ;;  %v757_v1 = vshll.u32 %v756_v9, 16 }
 0x978   :  { %v804_v59 = vpop.xlane.xlu1 %803 }
 0x979   :  { %v789_v4 = vpop.xlane.xlu0 %788  ;;  %vm805_vm4 = vcmp.eq.f32.partialorder %v802_v49, %v804_v59  ;;  %v810_v28 = vcvt.f32.s32 %v804_v59 }
 0x97a   :  { %v806_v8 = vsel %vm805_vm4, %v801_v62, -inf  ;;  %vm790_vm5 = vcmp.eq.f32.partialorder %v787_v7, %v789_v4  ;;  %v795_v31 = vcvt.f32.s32 %v789_v4 }
 0x97b   :  { %807 = vmax.xlane.f32.xlu1 %v806_v8  ;;  %v791_v60 = vsel %vm790_vm5, %v786_v52, -inf  ;;  %v811_v35 = vshll.u32 %v810_v28, 16 }
 0x97c   :  { %792 = vmax.xlane.f32.xlu0 %v791_v60  ;;  %v796_v38 = vshll.u32 %v795_v31, 16 }
 0x9f6   :  { %v768_v2 = vpop.xlane.xlu1 %767  ;;  %v754_v0 = vpop.xlane.xlu0 %753 }
 0x9f7   :  { %v769_v11 = vcvt.f32.s32 %v768_v2  ;;  %v755_v53 = vcvt.f32.s32 %v754_v0 }
 0x9f9   :  { %v772_v12 = vadd.s32 %v771_v10, %v769_v11  ;;  %v758_v13 = vadd.s32 %v757_v1, %v755_v53 }
 0x9fb   :  { %v774_v14 = vand.u32 127, %v772_v12  ;;  %v773_v15 = vand.u32 127, %v758_v13  ;;  %v776_v39 = vand.u32 4294967168, %v772_v12 }
 0x9fd   :  { %vm780_vm7 = vcmp.eq.s32.totalorder %v1649_v6, %v774_v14  ;;  %vm779_vm8 = vcmp.eq.s32.totalorder %v1649_v6, %v773_v15  ;;  %v826_v43 = vor.u32 %v776_v39, %v1649_v6 }
 0x9fe   :  { %v1906_v16 = vsel %vm780_vm7, 2147483647, %v1874_v19  ;;  %v1909_v17 = vsel %vm779_vm8, 2147483647, %v1877_v20  ;;  %v775_v20 = vand.u32 4294967168, %v758_v13 }
 0x9ff   :  { %v846_v18 = vshra.s32 %v1906_v16, 16  ;;  %v832_v21 = vshra.s32 %v1909_v17, 16 }
 0xa00   :  { %v825_v29 = vor.u32 %v775_v20, %v1649_v6 }
 0xa01   :  { %v848_v24 = vcvt.s32.f32 %v846_v18  ;;  %v834_v27 = vcvt.s32.f32 %v832_v21 }
 0xa03   :  { %849 = vmin.xlane.f32.xlu1 %v848_v24  ;;  %835 = vmin.xlane.f32.xlu0 %v834_v27 }
 0xa08   :  { %v808_v32 = vpop.xlane.xlu1 %807 }
 0xa09   :  { %v809_v36 = vcvt.f32.s32 %v808_v32  ;;  %v793_v37 = vpop.xlane.xlu0 %792 }
 0xa0a   :  { %v794_v19 = vcvt.f32.s32 %v793_v37 }
 0xa0b   :  { %v812_v22 = vadd.s32 %v811_v35, %v809_v36 }
 0xa0c   :  { %v797_v42 = vadd.s32 %v796_v38, %v794_v19 }
 0xa0d   :  { %v814_v25 = vand.u32 15, %v812_v22  ;;  %vm818_vm10 = vcmp.lt.s32.totalorder %v776_v39, %v812_v22 }
 0xa0e   :  { %v813_v23 = vand.u32 15, %v797_v42  ;;  %vm817_vm13 = vcmp.lt.s32.totalorder %v775_v20, %v797_v42 }
 0xa0f   :  { %vm816_vm9 = vcmp.eq.s32.totalorder %v1649_v6, %v814_v25 }
 0xa10   :  { %vm824_vm11 = vmand %vm816_vm9, %vm818_vm10  ;;  %vm815_vm12 = vcmp.eq.s32.totalorder %v1649_v6, %v813_v23 }
 0xa11   :  { %v1918_v26 = vsel %vm824_vm11, %v774_v14, %v1886_v30  ;;  %vm823_vm14 = vmand %vm815_vm12, %vm817_vm13  ;;  %v1921_v44 = vsel %vm824_vm11, %v826_v43, %v1889_v33  ;;  %v845_v33 = vand.u32 65535, %v1906_v16 }
 0xa12   :  { %v1924_v45 = vsel %vm823_vm14, %v773_v15, %v1892_v48  ;;  %v884_v47 = vsel %vm31_vm6, %v1921_v44, 2147483648  ;;  %v1929_v46 = vsel %vm823_vm14, %v825_v29, %v1897_v58  ;;  %v831_v48 = vand.u32 65535, %v1909_v17 }
 0xa13   :  { %v886_v54 = vshra.s32 %v884_v47, 16  ;;  %v869_v51 = vsel %vm31_vm6, %v1929_v46, 2147483648  ;;  %v847_v40 = vcvt.s32.f32 %v845_v33  ;;  %v885_v56 = vand.u32 65535, %v884_v47 }
 0xa14   :  { %v871_v49 = vshra.s32 %v869_v51, 16  ;;  %v833_v41 = vcvt.s32.f32 %v831_v48  ;;  %v870_v61 = vand.u32 65535, %v869_v51 }
 0xa15   :  { %v888_v30 = vcvt.s32.f32 %v886_v54  ;;  %v887_v3 = vcvt.s32.f32 %v885_v56 }
 0xa16   :  { %v873_v7 = vcvt.s32.f32 %v871_v49  ;;  %v872_v59 = vcvt.s32.f32 %v870_v61 }
 0xa17   :  { %889 = vmax.xlane.f32.xlu1 %v888_v30 }
 0xa18   :  { %874 = vmax.xlane.f32.xlu0 %v873_v7 }
 0xa90   :  { %v850_v34 = vpop.xlane.xlu1 %849  ;;  %v836_v50 = vpop.xlane.xlu0 %835 }
 0xa91   :  { %vm851_vm15 = vcmp.eq.f32.partialorder %v848_v24, %v850_v34  ;;  %vm837_vm0 = vcmp.eq.f32.partialorder %v834_v27, %v836_v50  ;;  %v856_v52 = vcvt.f32.s32 %v850_v34  ;;  %v842_v8 = vcvt.f32.s32 %v836_v50 }
 0xa92   :  { %v852_v58 = vsel %vm851_vm15, %v847_v40, inf  ;;  %v838_v55 = vsel %vm837_vm0, %v833_v41, inf }
 0xa93   :  { %853 = vmin.xlane.f32.xlu1 %v852_v58  ;;  %839 = vmin.xlane.f32.xlu0 %v838_v55  ;;  %v857_v9 = vshll.u32 %v856_v52, 16  ;;  %v843_v2 = vshll.u32 %v842_v8, 16 }
 0xaa4   :  { %v890_v57 = vpop.xlane.xlu1 %889 }
 0xaa5   :  { %v875_v5 = vpop.xlane.xlu0 %874  ;;  %vm891_vm1 = vcmp.eq.f32.partialorder %v888_v30, %v890_v57  ;;  %v896_v27 = vcvt.f32.s32 %v890_v57 }
 0xaa6   :  { %v892_v62 = vsel %vm891_vm1, %v887_v3, -inf  ;;  %vm876_vm2 = vcmp.eq.f32.partialorder %v873_v7, %v875_v5  ;;  %v881_v28 = vcvt.f32.s32 %v875_v5 }
 0xaa7   :  { %893 = vmax.xlane.f32.xlu1 %v892_v62  ;;  %v877_v4 = vsel %vm876_vm2, %v872_v59, -inf  ;;  %v897_v32 = vshll.u32 %v896_v27, 16 }
 0xaa8   :  { %878 = vmax.xlane.f32.xlu0 %v877_v4  ;;  %v882_v37 = vshll.u32 %v881_v28, 16 }
 0xb20   :  { %v854_v60 = vpop.xlane.xlu1 %853  ;;  %v840_v63 = vpop.xlane.xlu0 %839 }
 0xb21   :  { %v855_v0 = vcvt.f32.s32 %v854_v60  ;;  %v841_v10 = vcvt.f32.s32 %v840_v63 }
 0xb23   :  { %v858_v1 = vadd.s32 %v857_v9, %v855_v0  ;;  %v844_v11 = vadd.s32 %v843_v2, %v841_v10 }
 0xb25   :  { %v860_v53 = vand.u32 127, %v858_v1  ;;  %v859_v12 = vand.u32 127, %v844_v11  ;;  %v862_v38 = vand.u32 4294967168, %v858_v1 }
 0xb27   :  { %vm866_vm3 = vcmp.eq.s32.totalorder %v1649_v6, %v860_v53  ;;  %vm865_vm4 = vcmp.eq.s32.totalorder %v1649_v6, %v859_v12  ;;  %v912_v42 = vor.u32 %v862_v38, %v1649_v6 }
 0xb28   :  { %v1938_v13 = vsel %vm866_vm3, 2147483647, %v1906_v16  ;;  %v1941_v14 = vsel %vm865_vm4, 2147483647, %v1909_v17  ;;  %v861_v17 = vand.u32 4294967168, %v844_v11 }
 0xb29   :  { %v932_v15 = vshra.s32 %v1938_v13, 16  ;;  %v918_v18 = vshra.s32 %v1941_v14, 16 }
 0xb2a   :  { %v911_v25 = vor.u32 %v861_v17, %v1649_v6 }
 0xb2b   :  { %v934_v21 = vcvt.s32.f32 %v932_v15  ;;  %v920_v24 = vcvt.s32.f32 %v918_v18 }
 0xb2d   :  { %935 = vmin.xlane.f32.xlu1 %v934_v21  ;;  %921 = vmin.xlane.f32.xlu0 %v920_v24 }
 0xb34   :  { %v894_v31 = vpop.xlane.xlu1 %893 }
 0xb35   :  { %v895_v35 = vcvt.f32.s32 %v894_v31  ;;  %v879_v36 = vpop.xlane.xlu0 %878 }
 0xb36   :  { %v880_v16 = vcvt.f32.s32 %v879_v36 }
 0xb37   :  { %v898_v19 = vadd.s32 %v897_v32, %v895_v35 }
 0xb38   :  { %v883_v39 = vadd.s32 %v882_v37, %v880_v16 }
 0xb39   :  { %v900_v22 = vand.u32 15, %v898_v19  ;;  %vm904_vm7 = vcmp.lt.s32.totalorder %v862_v38, %v898_v19 }
 0xb3a   :  { %v899_v20 = vand.u32 15, %v883_v39  ;;  %vm903_vm10 = vcmp.lt.s32.totalorder %v861_v17, %v883_v39 }
 0xb3b   :  { %vm902_vm5 = vcmp.eq.s32.totalorder %v1649_v6, %v900_v22 }
 0xb3c   :  { %vm910_vm8 = vmand %vm902_vm5, %vm904_vm7  ;;  %vm901_vm9 = vcmp.eq.s32.totalorder %v1649_v6, %v899_v20 }
 0xb3d   :  { %v1950_v23 = vsel %vm910_vm8, %v860_v53, %v1918_v26  ;;  %vm909_vm11 = vmand %vm901_vm9, %vm903_vm10  ;;  %v1953_v43 = vsel %vm910_vm8, %v912_v42, %v1921_v44  ;;  %v931_v44 = vand.u32 65535, %v1938_v13 }
 0xb3e   :  { %v1956_v29 = vsel %vm909_vm11, %v859_v12, %v1924_v45  ;;  %v970_v47 = vsel %vm31_vm6, %v1953_v43, 2147483648  ;;  %v1961_v54 = vsel %vm909_vm11, %v911_v25, %v1929_v46  ;;  %v917_v45 = vand.u32 65535, %v1941_v14 }
 0xb3f   :  { %v972_v51 = vshra.s32 %v970_v47, 16  ;;  %v955_v49 = vsel %vm31_vm6, %v1961_v54, 2147483648  ;;  %v933_v34 = vcvt.s32.f32 %v931_v44  ;;  %v971_v41 = vand.u32 65535, %v970_v47 }
 0xb40   :  { %v957_v30 = vshra.s32 %v955_v49, 16  ;;  %v919_v50 = vcvt.s32.f32 %v917_v45  ;;  %v956_v58 = vand.u32 65535, %v955_v49 }
 0xb41   :  { %v974_v26 = vcvt.s32.f32 %v972_v51  ;;  %v973_v56 = vcvt.s32.f32 %v971_v41 }
 0xb42   :  { %v959_v7 = vcvt.s32.f32 %v957_v30  ;;  %v958_v57 = vcvt.s32.f32 %v956_v58 }
 0xb43   :  { %975 = vmax.xlane.f32.xlu1 %v974_v26 }
 0xb44   :  { %960 = vmax.xlane.f32.xlu0 %v959_v7 }
 0xbba   :  { %v936_v33 = vpop.xlane.xlu1 %935  ;;  %v922_v48 = vpop.xlane.xlu0 %921 }
 0xbbb   :  { %vm937_vm12 = vcmp.eq.f32.partialorder %v934_v21, %v936_v33  ;;  %vm923_vm13 = vcmp.eq.f32.partialorder %v920_v24, %v922_v48  ;;  %v942_v59 = vcvt.f32.s32 %v936_v33  ;;  %v928_v62 = vcvt.f32.s32 %v922_v48 }
 0xbbc   :  { %v938_v46 = vsel %vm937_vm12, %v933_v34, inf  ;;  %v924_v40 = vsel %vm923_vm13, %v919_v50, inf }
 0xbbd   :  { %939 = vmin.xlane.f32.xlu1 %v938_v46  ;;  %925 = vmin.xlane.f32.xlu0 %v924_v40  ;;  %v943_v8 = vshll.u32 %v942_v59, 16  ;;  %v929_v60 = vshll.u32 %v928_v62, 16 }
 0xbd0   :  { %v976_v55 = vpop.xlane.xlu1 %975 }
 0xbd1   :  { %v961_v61 = vpop.xlane.xlu0 %960  ;;  %vm977_vm14 = vcmp.eq.f32.partialorder %v974_v26, %v976_v55  ;;  %v982_v24 = vcvt.f32.s32 %v976_v55 }
 0xbd2   :  { %v978_v3 = vsel %vm977_vm14, %v973_v56, -inf  ;;  %vm962_vm15 = vcmp.eq.f32.partialorder %v959_v7, %v961_v61  ;;  %v967_v27 = vcvt.f32.s32 %v961_v61 }
 0xbd3   :  { %979 = vmax.xlane.f32.xlu1 %v978_v3  ;;  %v963_v5 = vsel %vm962_vm15, %v958_v57, -inf  ;;  %v983_v31 = vshll.u32 %v982_v24, 16 }
 0xbd4   :  { %964 = vmax.xlane.f32.xlu0 %v963_v5  ;;  %v968_v36 = vshll.u32 %v967_v27, 16 }
 0xc4a   :  { %v940_v4 = vpop.xlane.xlu1 %939  ;;  %v926_v52 = vpop.xlane.xlu0 %925 }
 0xc4b   :  { %v941_v63 = vcvt.f32.s32 %v940_v4  ;;  %v927_v9 = vcvt.f32.s32 %v926_v52 }
 0xc4d   :  { %v944_v2 = vadd.s32 %v943_v8, %v941_v63  ;;  %v930_v0 = vadd.s32 %v929_v60, %v927_v9 }
 0xc4f   :  { %v946_v10 = vand.u32 127, %v944_v2  ;;  %v945_v1 = vand.u32 127, %v930_v0  ;;  %v948_v37 = vand.u32 4294967168, %v944_v2 }
 0xc51   :  { %vm952_vm0 = vcmp.eq.s32.totalorder %v1649_v6, %v946_v10  ;;  %vm951_vm1 = vcmp.eq.s32.totalorder %v1649_v6, %v945_v1  ;;  %v998_v39 = vor.u32 %v948_v37, %v1649_v6 }
 0xc52   :  { %v1970_v11 = vsel %vm952_vm0, 2147483647, %v1938_v13  ;;  %v1973_v53 = vsel %vm951_vm1, 2147483647, %v1941_v14  ;;  %v947_v14 = vand.u32 4294967168, %v930_v0 }
 0xc53   :  { %v1018_v12 = vshra.s32 %v1970_v11, 16  ;;  %v1004_v15 = vshra.s32 %v1973_v53, 16 }
 0xc54   :  { %v997_v22 = vor.u32 %v947_v14, %v1649_v6 }
 0xc55   :  { %v1020_v18 = vcvt.s32.f32 %v1018_v12  ;;  %v1006_v21 = vcvt.s32.f32 %v1004_v15 }
 0xc57   :  { %1021 = vmin.xlane.f32.xlu1 %v1020_v18  ;;  %1007 = vmin.xlane.f32.xlu0 %v1006_v21 }
 0xc60   :  { %v980_v28 = vpop.xlane.xlu1 %979 }
 0xc61   :  { %v981_v32 = vcvt.f32.s32 %v980_v28  ;;  %v965_v35 = vpop.xlane.xlu0 %964 }
 0xc62   :  { %v966_v13 = vcvt.f32.s32 %v965_v35 }
 0xc63   :  { %v984_v16 = vadd.s32 %v983_v31, %v981_v32 }
 0xc64   :  { %v969_v38 = vadd.s32 %v968_v36, %v966_v13 }
 0xc65   :  { %v986_v19 = vand.u32 15, %v984_v16  ;;  %vm990_vm3 = vcmp.lt.s32.totalorder %v948_v37, %v984_v16 }
 0xc66   :  { %v985_v17 = vand.u32 15, %v969_v38  ;;  %vm989_vm7 = vcmp.lt.s32.totalorder %v947_v14, %v969_v38 }
 0xc67   :  { %vm988_vm2 = vcmp.eq.s32.totalorder %v1649_v6, %v986_v19 }
 0xc68   :  { %vm996_vm4 = vmand %vm988_vm2, %vm990_vm3  ;;  %vm987_vm5 = vcmp.eq.s32.totalorder %v1649_v6, %v985_v17 }
 0xc69   :  { %v1982_v20 = vsel %vm996_vm4, %v946_v10, %v1950_v23  ;;  %vm995_vm8 = vmand %vm987_vm5, %vm989_vm7  ;;  %v1985_v42 = vsel %vm996_vm4, %v998_v39, %v1953_v43  ;;  %v1017_v43 = vand.u32 65535, %v1970_v11 }
 0xc6a   :  { %v1988_v25 = vsel %vm995_vm8, %v945_v1, %v1956_v29  ;;  %v1056_v47 = vsel %vm31_vm6, %v1985_v42, 2147483648  ;;  %v1993_v51 = vsel %vm995_vm8, %v997_v22, %v1961_v54  ;;  %v1003_v29 = vand.u32 65535, %v1973_v53 }
 0xc6b   :  { %v1058_v49 = vshra.s32 %v1056_v47, 16  ;;  %v1041_v30 = vsel %vm31_vm6, %v1993_v51, 2147483648  ;;  %v1019_v33 = vcvt.s32.f32 %v1017_v43  ;;  %v1057_v50 = vand.u32 65535, %v1056_v47 }
 0xc6c   :  { %v1043_v26 = vshra.s32 %v1041_v30, 16  ;;  %v1005_v48 = vcvt.s32.f32 %v1003_v29  ;;  %v1042_v46 = vand.u32 65535, %v1041_v30 }
 0xc6d   :  { %v1060_v23 = vcvt.s32.f32 %v1058_v49  ;;  %v1059_v41 = vcvt.s32.f32 %v1057_v50 }
 0xc6e   :  { %v1045_v7 = vcvt.s32.f32 %v1043_v26  ;;  %v1044_v55 = vcvt.s32.f32 %v1042_v46 }
 0xc6f   :  { %1061 = vmax.xlane.f32.xlu1 %v1060_v23 }
 0xc70   :  { %1046 = vmax.xlane.f32.xlu0 %v1045_v7 }
 0xce4   :  { %v1022_v44 = vpop.xlane.xlu1 %1021  ;;  %v1008_v45 = vpop.xlane.xlu0 %1007 }
 0xce5   :  { %vm1023_vm9 = vcmp.eq.f32.partialorder %v1020_v18, %v1022_v44  ;;  %vm1009_vm10 = vcmp.eq.f32.partialorder %v1006_v21, %v1008_v45  ;;  %v1028_v57 = vcvt.f32.s32 %v1022_v44  ;;  %v1014_v3 = vcvt.f32.s32 %v1008_v45 }
 0xce6   :  { %v1024_v54 = vsel %vm1023_vm9, %v1019_v33, inf  ;;  %v1010_v34 = vsel %vm1009_vm10, %v1005_v48, inf }
 0xce7   :  { %1025 = vmin.xlane.f32.xlu1 %v1024_v54  ;;  %1011 = vmin.xlane.f32.xlu0 %v1010_v34  ;;  %v1029_v62 = vshll.u32 %v1028_v57, 16  ;;  %v1015_v4 = vshll.u32 %v1014_v3, 16 }
 0xcfc   :  { %v1062_v40 = vpop.xlane.xlu1 %1061 }
 0xcfd   :  { %v1047_v58 = vpop.xlane.xlu0 %1046  ;;  %vm1063_vm11 = vcmp.eq.f32.partialorder %v1060_v23, %v1062_v40  ;;  %v1068_v21 = vcvt.f32.s32 %v1062_v40 }
 0xcfe   :  { %v1064_v56 = vsel %vm1063_vm11, %v1059_v41, -inf  ;;  %vm1048_vm12 = vcmp.eq.f32.partialorder %v1045_v7, %v1047_v58  ;;  %v1053_v24 = vcvt.f32.s32 %v1047_v58 }
 0xcff   :  { %1065 = vmax.xlane.f32.xlu1 %v1064_v56  ;;  %v1049_v61 = vsel %vm1048_vm12, %v1044_v55, -inf  ;;  %v1069_v28 = vshll.u32 %v1068_v21, 16 }
 0xd00   :  { %1050 = vmax.xlane.f32.xlu0 %v1049_v61  ;;  %v1054_v35 = vshll.u32 %v1053_v24, 16 }
 0xd74   :  { %v1026_v5 = vpop.xlane.xlu1 %1025  ;;  %v1012_v59 = vpop.xlane.xlu0 %1011 }
 0xd75   :  { %v1027_v52 = vcvt.f32.s32 %v1026_v5  ;;  %v1013_v8 = vcvt.f32.s32 %v1012_v59 }
 0xd77   :  { %v1030_v60 = vadd.s32 %v1029_v62, %v1027_v52  ;;  %v1016_v63 = vadd.s32 %v1015_v4, %v1013_v8 }
 0xd79   :  { %v1032_v9 = vand.u32 127, %v1030_v60  ;;  %v1031_v2 = vand.u32 127, %v1016_v63  ;;  %v1034_v36 = vand.u32 4294967168, %v1030_v60 }
 0xd7b   :  { %vm1038_vm13 = vcmp.eq.s32.totalorder %v1649_v6, %v1032_v9  ;;  %vm1037_vm14 = vcmp.eq.s32.totalorder %v1649_v6, %v1031_v2  ;;  %v1084_v38 = vor.u32 %v1034_v36, %v1649_v6 }
 0xd7c   :  { %v2002_v0 = vsel %vm1038_vm13, 2147483647, %v1970_v11  ;;  %v2005_v10 = vsel %vm1037_vm14, 2147483647, %v1973_v53  ;;  %v1033_v53 = vand.u32 4294967168, %v1016_v63 }
 0xd7d   :  { %v1104_v1 = vshra.s32 %v2002_v0, 16  ;;  %v1090_v12 = vshra.s32 %v2005_v10, 16 }
 0xd7e   :  { %v1083_v19 = vor.u32 %v1033_v53, %v1649_v6 }
 0xd7f   :  { %v1106_v15 = vcvt.s32.f32 %v1104_v1  ;;  %v1092_v18 = vcvt.s32.f32 %v1090_v12 }
 0xd81   :  { %1107 = vmin.xlane.f32.xlu1 %v1106_v15  ;;  %1093 = vmin.xlane.f32.xlu0 %v1092_v18 }
 0xd8c   :  { %v1066_v27 = vpop.xlane.xlu1 %1065 }
 0xd8d   :  { %v1067_v31 = vcvt.f32.s32 %v1066_v27  ;;  %v1051_v32 = vpop.xlane.xlu0 %1050 }
 0xd8e   :  { %v1052_v11 = vcvt.f32.s32 %v1051_v32 }
 0xd8f   :  { %v1070_v13 = vadd.s32 %v1069_v28, %v1067_v31 }
 0xd90   :  { %v1055_v37 = vadd.s32 %v1054_v35, %v1052_v11 }
 0xd91   :  { %v1072_v16 = vand.u32 15, %v1070_v13  ;;  %vm1076_vm0 = vcmp.lt.s32.totalorder %v1034_v36, %v1070_v13 }
 0xd92   :  { %v1071_v14 = vand.u32 15, %v1055_v37  ;;  %vm1075_vm3 = vcmp.lt.s32.totalorder %v1033_v53, %v1055_v37 }
 0xd93   :  { %vm1074_vm15 = vcmp.eq.s32.totalorder %v1649_v6, %v1072_v16 }
 0xd94   :  { %vm1082_vm1 = vmand %vm1074_vm15, %vm1076_vm0  ;;  %vm1073_vm2 = vcmp.eq.s32.totalorder %v1649_v6, %v1071_v14 }
 0xd95   :  { %v2014_v17 = vsel %vm1082_vm1, %v1032_v9, %v1982_v20  ;;  %vm1081_vm4 = vmand %vm1073_vm2, %vm1075_vm3  ;;  %v2017_v39 = vsel %vm1082_vm1, %v1084_v38, %v1985_v42  ;;  %v1103_v42 = vand.u32 65535, %v2002_v0 }
 0xd96   :  { %v2020_v22 = vsel %vm1081_vm4, %v1031_v2, %v1988_v25  ;;  %v1142_v47 = vsel %vm31_vm6, %v2017_v39, 2147483648  ;;  %v2025_v49 = vsel %vm1081_vm4, %v1083_v19, %v1993_v51  ;;  %v1089_v25 = vand.u32 65535, %v2005_v10 }
 0xd97   :  { %v1144_v30 = vshra.s32 %v1142_v47, 16  ;;  %v1127_v26 = vsel %vm31_vm6, %v2025_v49, 2147483648  ;;  %v1105_v44 = vcvt.s32.f32 %v1103_v42  ;;  %v1143_v48 = vand.u32 65535, %v1142_v47 }
 0xd98   :  { %v1129_v23 = vshra.s32 %v1127_v26, 16  ;;  %v1091_v45 = vcvt.s32.f32 %v1089_v25  ;;  %v1128_v54 = vand.u32 65535, %v1127_v26 }
 0xd99   :  { %v1146_v20 = vcvt.s32.f32 %v1144_v30  ;;  %v1145_v50 = vcvt.s32.f32 %v1143_v48 }
 0xd9a   :  { %v1131_v7 = vcvt.s32.f32 %v1129_v23  ;;  %v1130_v40 = vcvt.s32.f32 %v1128_v54 }
 0xd9b   :  { %1147 = vmax.xlane.f32.xlu1 %v1146_v20 }
 0xd9c   :  { %1132 = vmax.xlane.f32.xlu0 %v1131_v7 }
 0xe0e   :  { %v1108_v43 = vpop.xlane.xlu1 %1107  ;;  %v1094_v29 = vpop.xlane.xlu0 %1093 }
 0xe0f   :  { %vm1109_vm5 = vcmp.eq.f32.partialorder %v1106_v15, %v1108_v43  ;;  %vm1095_vm7 = vcmp.eq.f32.partialorder %v1092_v18, %v1094_v29  ;;  %v1114_v55 = vcvt.f32.s32 %v1108_v43  ;;  %v1100_v56 = vcvt.f32.s32 %v1094_v29 }
 0xe10   :  { %v1110_v51 = vsel %vm1109_vm5, %v1105_v44, inf  ;;  %v1096_v33 = vsel %vm1095_vm7, %v1091_v45, inf }
 0xe11   :  { %1111 = vmin.xlane.f32.xlu1 %v1110_v51  ;;  %1097 = vmin.xlane.f32.xlu0 %v1096_v33  ;;  %v1115_v3 = vshll.u32 %v1114_v55, 16  ;;  %v1101_v5 = vshll.u32 %v1100_v56, 16 }
 0xe28   :  { %v1148_v34 = vpop.xlane.xlu1 %1147 }
 0xe29   :  { %vm1149_vm8 = vcmp.eq.f32.partialorder %v1146_v20, %v1148_v34  ;;  %v1133_v46 = vpop.xlane.xlu0 %1132  ;;  %v1154_v18 = vcvt.f32.s32 %v1148_v34 }
 0xe2a   :  { %vm1134_vm9 = vcmp.eq.f32.partialorder %v1131_v7, %v1133_v46  ;;  %v1150_v41 = vsel %vm1149_vm8, %v1145_v50, -inf  ;;  %v1139_v21 = vcvt.f32.s32 %v1133_v46 }
 0xe2b   :  { %1151 = vmax.xlane.f32.xlu1 %v1150_v41  ;;  %v1135_v58 = vsel %vm1134_vm9, %v1130_v40, -inf  ;;  %v1155_v27 = vshll.u32 %v1154_v18, 16 }
 0xe2c   :  { %1136 = vmax.xlane.f32.xlu0 %v1135_v58  ;;  %v1140_v32 = vshll.u32 %v1139_v21, 16 }
 0xe9e   :  { %v1112_v61 = vpop.xlane.xlu1 %1111  ;;  %v1098_v57 = vpop.xlane.xlu0 %1097 }
 0xe9f   :  { %v1113_v59 = vcvt.f32.s32 %v1112_v61  ;;  %v1099_v62 = vcvt.f32.s32 %v1098_v57 }
 0xea1   :  { %v1116_v4 = vadd.s32 %v1115_v3, %v1113_v59  ;;  %v1102_v52 = vadd.s32 %v1101_v5, %v1099_v62 }
 0xea3   :  { %v1118_v8 = vand.u32 127, %v1116_v4  ;;  %v1117_v60 = vand.u32 127, %v1102_v52  ;;  %v1120_v35 = vand.u32 4294967168, %v1116_v4 }
 0xea5   :  { %vm1124_vm10 = vcmp.eq.s32.totalorder %v1649_v6, %v1118_v8  ;;  %vm1123_vm11 = vcmp.eq.s32.totalorder %v1649_v6, %v1117_v60  ;;  %v1170_v37 = vor.u32 %v1120_v35, %v1649_v6 }
 0xea6   :  { %v2034_v63 = vsel %vm1124_vm10, 2147483647, %v2002_v0  ;;  %v2037_v9 = vsel %vm1123_vm11, 2147483647, %v2005_v10  ;;  %v1119_v10 = vand.u32 4294967168, %v1102_v52 }
 0xea7   :  { %v1190_v2 = vshra.s32 %v2034_v63, 16  ;;  %v1176_v1 = vshra.s32 %v2037_v9, 16 }
 0xea8   :  { %v1169_v16 = vor.u32 %v1119_v10, %v1649_v6 }
 0xea9   :  { %v1192_v12 = vcvt.s32.f32 %v1190_v2  ;;  %v1178_v15 = vcvt.s32.f32 %v1176_v1 }
 0xeab   :  { %1193 = vmin.xlane.f32.xlu1 %v1192_v12  ;;  %1179 = vmin.xlane.f32.xlu0 %v1178_v15 }
 0xeb8   :  { %v1152_v24 = vpop.xlane.xlu1 %1151 }
 0xeb9   :  { %v1153_v28 = vcvt.f32.s32 %v1152_v24  ;;  %v1137_v31 = vpop.xlane.xlu0 %1136 }
 0xeba   :  { %v1138_v0 = vcvt.f32.s32 %v1137_v31 }
 0xebb   :  { %v1156_v11 = vadd.s32 %v1155_v27, %v1153_v28 }
 0xebc   :  { %v1141_v36 = vadd.s32 %v1140_v32, %v1138_v0 }
 0xebd   :  { %v1158_v13 = vand.u32 15, %v1156_v11  ;;  %vm1162_vm13 = vcmp.lt.s32.totalorder %v1120_v35, %v1156_v11 }
 0xebe   :  { %v1157_v53 = vand.u32 15, %v1141_v36  ;;  %vm1161_vm0 = vcmp.lt.s32.totalorder %v1119_v10, %v1141_v36 }
 0xebf   :  { %vm1160_vm12 = vcmp.eq.s32.totalorder %v1649_v6, %v1158_v13 }
 0xec0   :  { %vm1168_vm14 = vmand %vm1160_vm12, %vm1162_vm13  ;;  %vm1159_vm15 = vcmp.eq.s32.totalorder %v1649_v6, %v1157_v53 }
 0xec1   :  { %v2046_v14 = vsel %vm1168_vm14, %v1118_v8, %v2014_v17  ;;  %vm1167_vm1 = vmand %vm1159_vm15, %vm1161_vm0  ;;  %v2049_v38 = vsel %vm1168_vm14, %v1170_v37, %v2017_v39  ;;  %v1189_v39 = vand.u32 65535, %v2034_v63 }
 0xec2   :  { %v2052_v19 = vsel %vm1167_vm1, %v1117_v60, %v2020_v22  ;;  %v1228_v47 = vsel %vm31_vm6, %v2049_v38, 2147483648  ;;  %v2057_v30 = vsel %vm1167_vm1, %v1169_v16, %v2025_v49  ;;  %v1175_v22 = vand.u32 65535, %v2037_v9 }
 0xec3   :  { %v1230_v26 = vshra.s32 %v1228_v47, 16  ;;  %v1213_v23 = vsel %vm31_vm6, %v2057_v30, 2147483648  ;;  %v1191_v43 = vcvt.s32.f32 %v1189_v39  ;;  %v1229_v45 = vand.u32 65535, %v1228_v47 }
 0xec4   :  { %v1215_v20 = vshra.s32 %v1213_v23, 16  ;;  %v1177_v29 = vcvt.s32.f32 %v1175_v22  ;;  %v1214_v51 = vand.u32 65535, %v1213_v23 }
 0xec5   :  { %v1232_v17 = vcvt.s32.f32 %v1230_v26  ;;  %v1231_v48 = vcvt.s32.f32 %v1229_v45 }
 0xec6   :  { %v1217_v7 = vcvt.s32.f32 %v1215_v20  ;;  %v1216_v34 = vcvt.s32.f32 %v1214_v51 }
 0xec7   :  { %1233 = vmax.xlane.f32.xlu1 %v1232_v17 }
 0xec8   :  { %1218 = vmax.xlane.f32.xlu0 %v1217_v7 }
 0xf38   :  { %v1194_v42 = vpop.xlane.xlu1 %1193  ;;  %v1180_v25 = vpop.xlane.xlu0 %1179 }
 0xf39   :  { %vm1195_vm2 = vcmp.eq.f32.partialorder %v1192_v12, %v1194_v42  ;;  %vm1181_vm3 = vcmp.eq.f32.partialorder %v1178_v15, %v1180_v25  ;;  %v1200_v40 = vcvt.f32.s32 %v1194_v42  ;;  %v1186_v41 = vcvt.f32.s32 %v1180_v25 }
 0xf3a   :  { %v1196_v49 = vsel %vm1195_vm2, %v1191_v43, inf  ;;  %v1182_v44 = vsel %vm1181_vm3, %v1177_v29, inf }
 0xf3b   :  { %1197 = vmin.xlane.f32.xlu1 %v1196_v49  ;;  %1183 = vmin.xlane.f32.xlu0 %v1182_v44  ;;  %v1201_v56 = vshll.u32 %v1200_v40, 16  ;;  %v1187_v61 = vshll.u32 %v1186_v41, 16 }
 0xf54   :  { %v1234_v33 = vpop.xlane.xlu1 %1233 }
 0xf55   :  { %vm1235_vm4 = vcmp.eq.f32.partialorder %v1232_v17, %v1234_v33  ;;  %v1219_v54 = vpop.xlane.xlu0 %1218  ;;  %v1240_v15 = vcvt.f32.s32 %v1234_v33 }
 0xf56   :  { %vm1220_vm5 = vcmp.eq.f32.partialorder %v1217_v7, %v1219_v54  ;;  %v1236_v50 = vsel %vm1235_vm4, %v1231_v48, -inf  ;;  %v1225_v18 = vcvt.f32.s32 %v1219_v54 }
 0xf57   :  { %1237 = vmax.xlane.f32.xlu1 %v1236_v50  ;;  %v1221_v46 = vsel %vm1220_vm5, %v1216_v34, -inf  ;;  %v1241_v24 = vshll.u32 %v1240_v15, 16 }
 0xf58   :  { %1222 = vmax.xlane.f32.xlu0 %v1221_v46  ;;  %v1226_v31 = vshll.u32 %v1225_v18, 16 }
 0xfc8   :  { %v1198_v58 = vpop.xlane.xlu1 %1197  ;;  %v1184_v55 = vpop.xlane.xlu0 %1183 }
 0xfc9   :  { %v1199_v57 = vcvt.f32.s32 %v1198_v58  ;;  %v1185_v3 = vcvt.f32.s32 %v1184_v55 }
 0xfcb   :  { %v1202_v5 = vadd.s32 %v1201_v56, %v1199_v57  ;;  %v1188_v59 = vadd.s32 %v1187_v61, %v1185_v3 }
 0xfcd   :  { %v1204_v62 = vand.u32 127, %v1202_v5  ;;  %v1203_v4 = vand.u32 127, %v1188_v59  ;;  %v1206_v32 = vand.u32 4294967168, %v1202_v5 }
 0xfcf   :  { %vm1210_vm7 = vcmp.eq.s32.totalorder %v1649_v6, %v1204_v62  ;;  %vm1209_vm8 = vcmp.eq.s32.totalorder %v1649_v6, %v1203_v4  ;;  %v1256_v36 = vor.u32 %v1206_v32, %v1649_v6 }
 0xfd0   :  { %v2066_v52 = vsel %vm1210_vm7, 2147483647, %v2034_v63  ;;  %v2069_v8 = vsel %vm1209_vm8, 2147483647, %v2037_v9  ;;  %v1205_v9 = vand.u32 4294967168, %v1188_v59 }
 0xfd1   :  { %v1276_v60 = vshra.s32 %v2066_v52, 16  ;;  %v1262_v2 = vshra.s32 %v2069_v8, 16 }
 0xfd2   :  { %v1255_v13 = vor.u32 %v1205_v9, %v1649_v6 }
 0xfd3   :  { %v1278_v1 = vcvt.s32.f32 %v1276_v60  ;;  %v1264_v12 = vcvt.s32.f32 %v1262_v2 }
 0xfd5   :  { %1279 = vmin.xlane.f32.xlu1 %v1278_v1  ;;  %1265 = vmin.xlane.f32.xlu0 %v1264_v12 }
 0xfe4   :  { %v1238_v21 = vpop.xlane.xlu1 %1237 }
 0xfe5   :  { %v1239_v27 = vcvt.f32.s32 %v1238_v21  ;;  %v1223_v28 = vpop.xlane.xlu0 %1222 }
 0xfe6   :  { %v1224_v63 = vcvt.f32.s32 %v1223_v28 }
 0xfe7   :  { %v1242_v0 = vadd.s32 %v1241_v24, %v1239_v27 }
 0xfe8   :  { %v1227_v35 = vadd.s32 %v1226_v31, %v1224_v63 }
 0xfe9   :  { %v1244_v11 = vand.u32 15, %v1242_v0  ;;  %vm1248_vm10 = vcmp.lt.s32.totalorder %v1206_v32, %v1242_v0 }
 0xfea   :  { %v1243_v10 = vand.u32 15, %v1227_v35  ;;  %vm1247_vm13 = vcmp.lt.s32.totalorder %v1205_v9, %v1227_v35 }
 0xfeb   :  { %vm1246_vm9 = vcmp.eq.s32.totalorder %v1649_v6, %v1244_v11 }
 0xfec   :  { %vm1254_vm11 = vmand %vm1246_vm9, %vm1248_vm10  ;;  %vm1245_vm12 = vcmp.eq.s32.totalorder %v1649_v6, %v1243_v10 }
 0xfed   :  { %v2078_v53 = vsel %vm1254_vm11, %v1204_v62, %v2046_v14  ;;  %vm1253_vm14 = vmand %vm1245_vm12, %vm1247_vm13  ;;  %v2081_v37 = vsel %vm1254_vm11, %v1256_v36, %v2049_v38  ;;  %v1275_v38 = vand.u32 65535, %v2066_v52 }
 0xfee   :  { %v2084_v16 = vsel %vm1253_vm14, %v1203_v4, %v2052_v19  ;;  %v1314_v47 = vsel %vm31_vm6, %v2081_v37, 2147483648  ;;  %v2089_v26 = vsel %vm1253_vm14, %v1255_v13, %v2057_v30  ;;  %v1261_v19 = vand.u32 65535, %v2069_v8 }
 0xfef   :  { %v1316_v23 = vshra.s32 %v1314_v47, 16  ;;  %v1299_v20 = vsel %vm31_vm6, %v2089_v26, 2147483648  ;;  %v1277_v42 = vcvt.s32.f32 %v1275_v38  ;;  %v1315_v29 = vand.u32 65535, %v1314_v47 }
 0xff0   :  { %v1301_v17 = vshra.s32 %v1299_v20, 16  ;;  %v1263_v25 = vcvt.s32.f32 %v1261_v19  ;;  %v1300_v49 = vand.u32 65535, %v1299_v20 }
 0xff1   :  { %v1318_v14 = vcvt.s32.f32 %v1316_v23  ;;  %v1317_v45 = vcvt.s32.f32 %v1315_v29 }
 0xff2   :  { %v1303_v7 = vcvt.s32.f32 %v1301_v17  ;;  %v1302_v33 = vcvt.s32.f32 %v1300_v49 }
 0xff3   :  { %1319 = vmax.xlane.f32.xlu1 %v1318_v14 }
 0xff4   :  { %1304 = vmax.xlane.f32.xlu0 %v1303_v7 }
0x1062   :  { %v1280_v39 = vpop.xlane.xlu1 %1279  ;;  %v1266_v22 = vpop.xlane.xlu0 %1265 }
0x1063   :  { %vm1281_vm15 = vcmp.eq.f32.partialorder %v1278_v1, %v1280_v39  ;;  %vm1267_vm0 = vcmp.eq.f32.partialorder %v1264_v12, %v1266_v22  ;;  %v1286_v34 = vcvt.f32.s32 %v1280_v39  ;;  %v1272_v50 = vcvt.f32.s32 %v1266_v22 }
0x1064   :  { %v1282_v30 = vsel %vm1281_vm15, %v1277_v42, inf  ;;  %v1268_v43 = vsel %vm1267_vm0, %v1263_v25, inf }
0x1065   :  { %1283 = vmin.xlane.f32.xlu1 %v1282_v30  ;;  %1269 = vmin.xlane.f32.xlu0 %v1268_v43  ;;  %v1287_v41 = vshll.u32 %v1286_v34, 16  ;;  %v1273_v58 = vshll.u32 %v1272_v50, 16 }
0x1080   :  { %v1320_v44 = vpop.xlane.xlu1 %1319 }
0x1081   :  { %vm1321_vm1 = vcmp.eq.f32.partialorder %v1318_v14, %v1320_v44  ;;  %v1305_v51 = vpop.xlane.xlu0 %1304  ;;  %v1326_v12 = vcvt.f32.s32 %v1320_v44 }
0x1082   :  { %vm1306_vm2 = vcmp.eq.f32.partialorder %v1303_v7, %v1305_v51  ;;  %v1322_v48 = vsel %vm1321_vm1, %v1317_v45, -inf  ;;  %v1311_v15 = vcvt.f32.s32 %v1305_v51 }
0x1083   :  { %1323 = vmax.xlane.f32.xlu1 %v1322_v48  ;;  %v1307_v54 = vsel %vm1306_vm2, %v1302_v33, -inf  ;;  %v1327_v21 = vshll.u32 %v1326_v12, 16 }
0x1084   :  { %1308 = vmax.xlane.f32.xlu0 %v1307_v54  ;;  %v1312_v28 = vshll.u32 %v1311_v15, 16 }
0x10f2   :  { %v1284_v46 = vpop.xlane.xlu1 %1283  ;;  %v1270_v40 = vpop.xlane.xlu0 %1269 }
0x10f3   :  { %v1285_v55 = vcvt.f32.s32 %v1284_v46  ;;  %v1271_v56 = vcvt.f32.s32 %v1270_v40 }
0x10f5   :  { %v1288_v61 = vadd.s32 %v1287_v41, %v1285_v55  ;;  %v1274_v57 = vadd.s32 %v1273_v58, %v1271_v56 }
0x10f7   :  { %v1290_v3 = vand.u32 127, %v1288_v61  ;;  %v1289_v5 = vand.u32 127, %v1274_v57  ;;  %v1292_v31 = vand.u32 4294967168, %v1288_v61 }
0x10f9   :  { %vm1296_vm3 = vcmp.eq.s32.totalorder %v1649_v6, %v1290_v3  ;;  %vm1295_vm4 = vcmp.eq.s32.totalorder %v1649_v6, %v1289_v5  ;;  %v1342_v35 = vor.u32 %v1292_v31, %v1649_v6 }
0x10fa   :  { %v2098_v59 = vsel %vm1296_vm3, 2147483647, %v2066_v52  ;;  %v2101_v62 = vsel %vm1295_vm4, 2147483647, %v2069_v8  ;;  %v1291_v8 = vand.u32 4294967168, %v1274_v57 }
0x10fb   :  { %v1362_v4 = vshra.s32 %v2098_v59, 16  ;;  %v1348_v60 = vshra.s32 %v2101_v62, 16 }
0x10fc   :  { %v1341_v11 = vor.u32 %v1291_v8, %v1649_v6 }
0x10fd   :  { %v1364_v2 = vcvt.s32.f32 %v1362_v4  ;;  %v1350_v1 = vcvt.s32.f32 %v1348_v60 }
0x10ff   :  { %1365 = vmin.xlane.f32.xlu1 %v1364_v2  ;;  %1351 = vmin.xlane.f32.xlu0 %v1350_v1 }
0x1110   :  { %v1324_v18 = vpop.xlane.xlu1 %1323 }
0x1111   :  { %v1325_v24 = vcvt.f32.s32 %v1324_v18  ;;  %v1309_v27 = vpop.xlane.xlu0 %1308 }
0x1112   :  { %v1310_v52 = vcvt.f32.s32 %v1309_v27 }
0x1113   :  { %v1328_v63 = vadd.s32 %v1327_v21, %v1325_v24 }
0x1114   :  { %v1313_v32 = vadd.s32 %v1312_v28, %v1310_v52 }
0x1115   :  { %v1330_v0 = vand.u32 15, %v1328_v63  ;;  %vm1334_vm7 = vcmp.lt.s32.totalorder %v1292_v31, %v1328_v63 }
0x1116   :  { %v1329_v9 = vand.u32 15, %v1313_v32  ;;  %vm1333_vm10 = vcmp.lt.s32.totalorder %v1291_v8, %v1313_v32 }
0x1117   :  { %vm1332_vm5 = vcmp.eq.s32.totalorder %v1649_v6, %v1330_v0 }
0x1118   :  { %vm1340_vm8 = vmand %vm1332_vm5, %vm1334_vm7  ;;  %vm1331_vm9 = vcmp.eq.s32.totalorder %v1649_v6, %v1329_v9 }
0x1119   :  { %v2110_v10 = vsel %vm1340_vm8, %v1290_v3, %v2078_v53  ;;  %vm1339_vm11 = vmand %vm1331_vm9, %vm1333_vm10  ;;  %v2113_v36 = vsel %vm1340_vm8, %v1342_v35, %v2081_v37  ;;  %v1361_v37 = vand.u32 65535, %v2098_v59 }
0x111a   :  { %v2116_v13 = vsel %vm1339_vm11, %v1289_v5, %v2084_v16  ;;  %v1400_v47 = vsel %vm31_vm6, %v2113_v36, 2147483648  ;;  %v2121_v23 = vsel %vm1339_vm11, %v1341_v11, %v2089_v26  ;;  %v1347_v16 = vand.u32 65535, %v2101_v62 }
0x111b   :  { %v1402_v20 = vshra.s32 %v1400_v47, 16  ;;  %v1385_v17 = vsel %vm31_vm6, %v2121_v23, 2147483648  ;;  %v1363_v39 = vcvt.s32.f32 %v1361_v37  ;;  %v1401_v25 = vand.u32 65535, %v1400_v47 }
0x111c   :  { %v1387_v14 = vshra.s32 %v1385_v17, 16  ;;  %v1349_v22 = vcvt.s32.f32 %v1347_v16  ;;  %v1386_v30 = vand.u32 65535, %v1385_v17 }
0x111d   :  { %v1404_v53 = vcvt.s32.f32 %v1402_v20  ;;  %v1403_v29 = vcvt.s32.f32 %v1401_v25 }
0x111e   :  { %v1389_v7 = vcvt.s32.f32 %v1387_v14  ;;  %v1388_v44 = vcvt.s32.f32 %v1386_v30 }
0x111f   :  { %1405 = vmax.xlane.f32.xlu1 %v1404_v53 }
0x1120   :  { %1390 = vmax.xlane.f32.xlu0 %v1389_v7 }
0x118c   :  { %v1366_v38 = vpop.xlane.xlu1 %1365  ;;  %v1352_v19 = vpop.xlane.xlu0 %1351 }
0x118d   :  { %vm1367_vm12 = vcmp.eq.f32.partialorder %v1364_v2, %v1366_v38  ;;  %vm1353_vm13 = vcmp.eq.f32.partialorder %v1350_v1, %v1352_v19  ;;  %v1372_v33 = vcvt.f32.s32 %v1366_v38  ;;  %v1358_v48 = vcvt.f32.s32 %v1352_v19 }
0x118e   :  { %v1368_v26 = vsel %vm1367_vm12, %v1363_v39, inf  ;;  %v1354_v42 = vsel %vm1353_vm13, %v1349_v22, inf }
0x118f   :  { %1369 = vmin.xlane.f32.xlu1 %v1368_v26  ;;  %1355 = vmin.xlane.f32.xlu0 %v1354_v42  ;;  %v1373_v50 = vshll.u32 %v1372_v33, 16  ;;  %v1359_v46 = vshll.u32 %v1358_v48, 16 }
0x11ac   :  { %v1406_v43 = vpop.xlane.xlu1 %1405 }
0x11ad   :  { %vm1407_vm14 = vcmp.eq.f32.partialorder %v1404_v53, %v1406_v43  ;;  %v1391_v49 = vpop.xlane.xlu0 %1390  ;;  %v1412_v1 = vcvt.f32.s32 %v1406_v43 }
0x11ae   :  { %vm1392_vm15 = vcmp.eq.f32.partialorder %v1389_v7, %v1391_v49  ;;  %v1408_v45 = vsel %vm1407_vm14, %v1403_v29, -inf  ;;  %v1397_v12 = vcvt.f32.s32 %v1391_v49 }
0x11af   :  { %1409 = vmax.xlane.f32.xlu1 %v1408_v45  ;;  %v1393_v51 = vsel %vm1392_vm15, %v1388_v44, -inf  ;;  %v1413_v18 = vshll.u32 %v1412_v1, 16 }
0x11b0   :  { %1394 = vmax.xlane.f32.xlu0 %v1393_v51  ;;  %v1398_v27 = vshll.u32 %v1397_v12, 16 }
0x121c   :  { %v1370_v54 = vpop.xlane.xlu1 %1369  ;;  %v1356_v34 = vpop.xlane.xlu0 %1355 }
0x121d   :  { %v1371_v40 = vcvt.f32.s32 %v1370_v54  ;;  %v1357_v41 = vcvt.f32.s32 %v1356_v34 }
0x121f   :  { %v1374_v58 = vadd.s32 %v1373_v50, %v1371_v40  ;;  %v1360_v55 = vadd.s32 %v1359_v46, %v1357_v41 }
0x1221   :  { %v1376_v56 = vand.u32 127, %v1374_v58  ;;  %v1375_v61 = vand.u32 127, %v1360_v55  ;;  %v1378_v52 = vand.u32 4294967168, %v1374_v58  ;;  %v1377_v63 = vand.u32 4294967168, %v1360_v55 }
0x1223   :  { %vm1382_vm0 = vcmp.eq.s32.totalorder %v1649_v6, %v1376_v56  ;;  %vm1381_vm1 = vcmp.eq.s32.totalorder %v1649_v6, %v1375_v61  ;;  %v1428_v32 = vor.u32 %v1378_v52, %v1649_v6  ;;  %v1427_v0 = vor.u32 %v1377_v63, %v1649_v6 }
0x1224   :  { %v1384_v57 = vsel %vm1382_vm0, 2147483647, %v2098_v59  ;;  %v1383_v3 = vsel %vm1381_vm1, 2147483647, %v2101_v62 }
0x1225   :  { %v1448_v5 = vshra.s32 %v1384_v57, 16  ;;  %v1434_v4 = vshra.s32 %v1383_v3, 16  ;;  %v1433_v37 = vand.u32 65535, %v1383_v3 }
0x1227   :  { %v1450_v60 = vcvt.s32.f32 %v1448_v5  ;;  %v1436_v2 = vcvt.s32.f32 %v1434_v4  ;;  %v1435_v19 = vcvt.s32.f32 %v1433_v37 }
0x1229   :  { %1451 = vmin.xlane.f32.xlu1 %v1450_v60  ;;  %1437 = vmin.xlane.f32.xlu0 %v1436_v2 }
0x123c   :  { %v1410_v15 = vpop.xlane.xlu1 %1409 }
0x123d   :  { %v1411_v21 = vcvt.f32.s32 %v1410_v15  ;;  %v1395_v24 = vpop.xlane.xlu0 %1394 }
0x123e   :  { %v1396_v28 = vcvt.f32.s32 %v1395_v24 }
0x123f   :  { %v1414_v31 = vadd.s32 %v1413_v18, %v1411_v21 }
0x1240   :  { %v1399_v59 = vadd.s32 %v1398_v27, %v1396_v28 }
0x1241   :  { %v1416_v8 = vand.u32 15, %v1414_v31  ;;  %vm1420_vm3 = vcmp.lt.s32.totalorder %v1378_v52, %v1414_v31 }
0x1242   :  { %v1415_v62 = vand.u32 15, %v1399_v59  ;;  %vm1419_vm7 = vcmp.lt.s32.totalorder %v1377_v63, %v1399_v59 }
0x1243   :  { %vm1418_vm2 = vcmp.eq.s32.totalorder %v1649_v6, %v1416_v8 }
0x1244   :  { %vm1426_vm4 = vmand %vm1418_vm2, %vm1420_vm3  ;;  %vm1417_vm5 = vcmp.eq.s32.totalorder %v1649_v6, %v1415_v62 }
0x1245   :  { %v2136_v9 = vsel %vm1426_vm4, %v1376_v56, %v2110_v10  ;;  %vm1425_vm8 = vmand %vm1417_vm5, %vm1419_vm7  ;;  %v2139_v35 = vsel %vm1426_vm4, %v1428_v32, %v2113_v36  ;;  %v1447_v36 = vand.u32 65535, %v1384_v57 }
0x1246   :  { %v2142_v11 = vsel %vm1425_vm8, %v1375_v61, %v2116_v13  ;;  %v1482_v47 = vsel %vm31_vm6, %v2139_v35, 2147483648  ;;  %v2147_v20 = vsel %vm1425_vm8, %v1427_v0, %v2121_v23 }
0x1247   :  { %v1484_v17 = vshra.s32 %v1482_v47, 16  ;;  %v1467_v14 = vsel %vm31_vm6, %v2147_v20, 2147483648  ;;  %v1449_v38 = vcvt.s32.f32 %v1447_v36  ;;  %v1483_v22 = vand.u32 65535, %v1482_v47 }
0x1248   :  { %v1469_v53 = vshra.s32 %v1467_v14, 16  ;;  %v1468_v26 = vand.u32 65535, %v1467_v14 }
0x1249   :  { %v1486_v10 = vcvt.s32.f32 %v1484_v17  ;;  %v1485_v25 = vcvt.s32.f32 %v1483_v22 }
0x124a   :  { %v1471_v7 = vcvt.s32.f32 %v1469_v53  ;;  %v1470_v43 = vcvt.s32.f32 %v1468_v26 }
0x124b   :  { %1487 = vmax.xlane.f32.xlu1 %v1486_v10 }
0x124c   :  { %1472 = vmax.xlane.f32.xlu0 %v1471_v7 }
0x12b6   :  { %v1452_v16 = vpop.xlane.xlu1 %1451  ;;  %v1438_v13 = vpop.xlane.xlu0 %1437 }
0x12b7   :  { %vm1453_vm9 = vcmp.eq.f32.partialorder %v1450_v60, %v1452_v16  ;;  %vm1439_vm10 = vcmp.eq.f32.partialorder %v1436_v2, %v1438_v13  ;;  %v1458_v45 = vcvt.f32.s32 %v1452_v16  ;;  %v1444_v33 = vcvt.f32.s32 %v1438_v13 }
0x12b8   :  { %v1454_v39 = vsel %vm1453_vm9, %v1449_v38, inf  ;;  %v1440_v23 = vsel %vm1439_vm10, %v1435_v19, inf }
0x12b9   :  { %1455 = vmin.xlane.f32.xlu1 %v1454_v39  ;;  %1441 = vmin.xlane.f32.xlu0 %v1440_v23  ;;  %v1459_v34 = vshll.u32 %v1458_v45, 16  ;;  %v1445_v46 = vshll.u32 %v1444_v33, 16 }
0x12d8   :  { %v1488_v42 = vpop.xlane.xlu1 %1487 }
0x12d9   :  { %vm1489_vm11 = vcmp.eq.f32.partialorder %v1486_v10, %v1488_v42  ;;  %v1473_v30 = vpop.xlane.xlu0 %1472  ;;  %v1494_v50 = vcvt.f32.s32 %v1488_v42 }
0x12da   :  { %vm1474_vm12 = vcmp.eq.f32.partialorder %v1471_v7, %v1473_v30  ;;  %v1490_v29 = vsel %vm1489_vm11, %v1485_v25, -inf  ;;  %v1479_v40 = vcvt.f32.s32 %v1473_v30 }
0x12db   :  { %1491 = vmax.xlane.f32.xlu1 %v1490_v29  ;;  %v1475_v49 = vsel %vm1474_vm12, %v1470_v43, -inf  ;;  %v1495_v56 = vshll.u32 %v1494_v50, 16 }
0x12dc   :  { %1476 = vmax.xlane.f32.xlu0 %v1475_v49  ;;  %v1480_v3 = vshll.u32 %v1479_v40, 16 }
0x1346   :  { %v1456_v44 = vpop.xlane.xlu1 %1455  ;;  %v1442_v51 = vpop.xlane.xlu0 %1441 }
0x1347   :  { %v1457_v48 = vcvt.f32.s32 %v1456_v44  ;;  %v1443_v54 = vcvt.f32.s32 %v1442_v51 }
0x1349   :  { %v1460_v41 = vadd.s32 %v1459_v34, %v1457_v48  ;;  %v1446_v58 = vadd.s32 %v1445_v46, %v1443_v54 }
0x134b   :  { %v1464_v4 = vand.u32 4294967168, %v1460_v41  ;;  %v1463_v2 = vand.u32 4294967168, %v1446_v58  ;;  %v1462_v18 = vand.u32 127, %v1460_v41  ;;  %v1461_v24 = vand.u32 127, %v1446_v58 }
0x134d   :  { %v1510_v21 = vor.u32 %v1464_v4, %v1649_v6  ;;  %v1509_v27 = vor.u32 %v1463_v2, %v1649_v6 }
0x1368   :  { %v1492_v55 = vpop.xlane.xlu1 %1491 }
0x1369   :  { %v1493_v61 = vcvt.f32.s32 %v1492_v55  ;;  %v1477_v57 = vpop.xlane.xlu0 %1476 }
0x136a   :  { %v1478_v5 = vcvt.f32.s32 %v1477_v57 }
0x136b   :  { %v1496_v60 = vadd.s32 %v1495_v56, %v1493_v61 }
0x136c   :  { %v1481_v1 = vadd.s32 %v1480_v3, %v1478_v5 }
0x136d   :  { %v1498_v12 = vand.u32 15, %v1496_v60  ;;  %vm1502_vm14 = vcmp.lt.s32.totalorder %v1464_v4, %v1496_v60 }
0x136e   :  { %v1497_v15 = vand.u32 15, %v1481_v1  ;;  %vm1501_vm1 = vcmp.lt.s32.totalorder %v1463_v2, %v1481_v1 }
0x136f   :  { %vm1500_vm13 = vcmp.eq.s32.totalorder %v1649_v6, %v1498_v12 }
0x1370   :  { %vm1508_vm15 = vmand %vm1500_vm13, %vm1502_vm14  ;;  %vm1499_vm0 = vcmp.eq.s32.totalorder %v1649_v6, %v1497_v15 }
0x1371   :  { %v1512_v28 = vsel %vm1508_vm15, %v1510_v21, %v2139_v35  ;;  %v1514_v52 = vsel %vm1508_vm15, %v1462_v18, %v2136_v9  ;;  %vm1507_vm2 = vmand %vm1499_vm0, %vm1501_vm1 }
0x1372   :  { %1516 = vst.msk [vmem:[#allocation2 + $0x8] sm:$0xff] %vm31_vm6, %v1512_v28  ;;  %1518 = vst.msk [vmem:[#allocation3 + $0x8] sm:$0xff] %vm31_vm6, %v1514_v52  ;;  %v1511_v31 = vsel %vm1507_vm2, %v1509_v27, %v2147_v20  ;;  %v1513_v6 = vsel %vm1507_vm2, %v1461_v24, %v2142_v11 }
0x1373   :  { %1523 = vst.msk [vmem:[#allocation7 + $0x8] sm:$0xff] %vm31_vm6, %v1514_v52  ;;  %1515 = vst.msk [vmem:[#allocation2] sm:$0xff] %vm31_vm6, %v1511_v31 }
0x1374   :  { %1517 = vst.msk [vmem:[#allocation3] sm:$0xff] %vm31_vm6, %v1513_v6  ;;  %1522 = vst.msk [vmem:[#allocation7] sm:$0xff] %vm31_vm6, %v1513_v6 }
0x1375   :  { %1589 = shalt.err (!%p1586_p0)
}
0x1376   :  { %s1590_s10 = scalar_lea.hbm %s2187_s4, 256 }
0x1377   :  { %p1591_p1 = scmp.ne.s32.totalorder %s2187_s4, %s1590_s10  ;;  %p1594_p2 = scmp.lt.u32.totalorder %s1590_s10, %s2187_s4 }
0x1379   :  { %p1596_p3 = pnand %p1594_p2, %p1591_p1 }
0x137b   :  { %1599 = shalt.err (!%p1596_p3)
}
0x137c   :  { %s1610_s15 = smov 128   ;;  %s1611_s16 = smov 8  }
0x137d   :  { %1535 = dma.vmem_to_hbm [thread:$0]  %s2155_s6, 256, %s2187_s4, [#allocation8], %s1610_s15, %s1610_s15, %s1611_s16  }
0x137e   :  { %1602 = dma.done.wait [#allocation8], 256  }
0x137f   :  { %1603 = vsyncadd [#allocation8], 4294967040 }
0x1380   :  { %1539 = vsyncpa [#allocation8], 1 }

</bundles_post_ra>
